<compile_context>
chip_gen: v7x
topology: tpu7x:2x2x1
jax: 0.10.0
libtpu: 0.0.40
codegen_flags: <defaults>
</compile_context>

<pallas_src>
import jax
import jax.numpy as jnp
import numpy as np
from jax import lax
from jax.experimental import pallas as pl
from jax.experimental.pallas import tpu as pltpu

K_DECONV = 16        # deconv kernel size
STRIDE = 2
K_CH = 3             # channel-gate conv kernel
K_SP = 7             # spatial-gate conv kernel
PAD_SP = K_SP // 2   # = 3
NEG_SLOPE = 0.01     # nn.LeakyReLU default
NSHIFT = K_DECONV // STRIDE + 1   # 9 shifted input views feed both output phases
HALO = 4             # input halo (left/right) for K=16, stride=2, padding=7

# 7-tap spatial conv on the interleaved t axis, rewritten on the phase-split rows.
# Entries are (source_phase, wsp_tap_index, m_offset):  output t=2m (+p) reads
# stat(phase=source_phase)[m + m_offset], weighted by wsp[:, tap_index].
EVEN_TAPS = ((1, 0, -2), (0, 1, -1), (1, 2, -1), (0, 3, 0),
             (1, 4, 0), (0, 5, 1), (1, 6, 1))
ODD_TAPS = ((0, 0, -1), (1, 1, -1), (0, 2, 0), (1, 3, 0),
            (0, 4, 1), (1, 5, 1), (0, 6, 2))


def attention_deconv_bn_kernel(
    x_ref,        # (NB, C_in, L + 2*HALO)  halo-padded input (VMEM)
    w_ref,        # (2*C_out, NSHIFT*C_in)  BN-folded, phase-stacked deconv weights
    shift_ref,    # (2*C_out, 1)            folded BN shift (+ deconv bias)
    wch_ref,      # (K_CH,)                 channel-gate conv taps (SMEM)
    bch_ref,      # (1,)                    channel-gate bias (SMEM)
    wsp_ref,      # (2, K_SP)               spatial-gate conv taps (SMEM)
    bsp_ref,      # (1,)                    spatial-gate bias (SMEM)
    out_ref,      # (1, 2*C_out, NB*L)      phase-stacked, lane-packed output block
    slab_ref,     # scratch (NSHIFT*C_in, NB*L)  im2col slab (VMEM)
):
    NB, C_in, _ = x_ref.shape
    _, C2, NBL = out_ref.shape
    C_out = C2 // 2
    L = NBL // NB
    f32 = jnp.float32

    # ---- hoisted SMEM scalar reads (used many times below, read once).
    wch = [wch_ref[k] for k in range(K_CH)]
    bch = bch_ref[0]
    wsp_avg = [wsp_ref[0, k] for k in range(K_SP)]
    wsp_max = [wsp_ref[1, k] for k in range(K_SP)]
    bsp = bsp_ref[0]
    ones_L = jnp.ones((1, L), f32)

    # ---- im2col slab for the whole block (samples folded into lanes).  All
    #      stores complete before the single MXU push -> no WAR serialization.
    for s in range(NB):
        for jj in range(NSHIFT):
            slab_ref[jj * C_in:(jj + 1) * C_in, s * L:(s + 1) * L] = \
                x_ref[s, :, jj:jj + L]

    # ---- ConvTranspose1d (both phases, all NB samples) as ONE MXU matmul;
    #      BN scale pre-folded into w, shift = folded bias; LeakyReLU;
    #      Dropout(eval) = identity.
    yab = jnp.dot(w_ref[...], slab_ref[...],
                  preferred_element_type=f32) + shift_ref[...]     # (2*C_out, NBL)
    yab = jnp.where(yab >= 0.0, yab, NEG_SLOPE * yab)

    y_even = yab[:C_out]      # output samples t = 2m      (C_out, NBL)
    y_odd = yab[C_out:]       # output samples t = 2m + 1  (C_out, NBL)

    # ---- CBAM channel gate: per-sample mean over t, 1x3 conv over channels as
    #      3 shifted VPU FMAs (no MXU round-trip), sigmoid, broadcast back to lanes.
    ysum = y_even + y_odd
    m_cols = [jnp.sum(ysum[:, s * L:(s + 1) * L], axis=1, keepdims=True)
              for s in range(NB)]
    m = jnp.concatenate(m_cols, axis=1) * (0.5 / L)                 # (C_out, NB)
    zrow = jnp.zeros((1, NB), f32)
    mp = jnp.concatenate([zrow, m, zrow], axis=0)                   # (C_out+2, NB)
    cm = (bch + wch[0] * mp[0:C_out]
          + wch[1] * mp[1:C_out + 1]
          + wch[2] * mp[2:C_out + 2])
    cm = jax.nn.sigmoid(cm)                                          # (C_out, NB)
    cm_packed = jnp.concatenate(
        [cm[:, s:s + 1] * ones_L for s in range(NB)], axis=1)        # (C_out, NBL)
    y_even = cm_packed * y_even
    y_odd = cm_packed * y_odd

    # ---- CBAM spatial gate: [mean, max] over channels, 7-tap conv (pad 3),
    #      sigmoid — on lane-packed stat rows with per-sample boundary masks.
    lane_l = lax.broadcasted_iota(jnp.int32, (1, L), 1)              # 0..L-1
    def seg_mask(off):                                               # (1, NBL)
        m1 = ((lane_l + off >= 0) & (lane_l + off < L)).astype(f32)
        return jnp.concatenate([m1] * NB, axis=1) if NB > 1 else m1
    masks = {off: seg_mask(off) for off in (-2, -1, 1, 2)}

    z2 = jnp.zeros((1, 2), f32)
    avg_pad = (jnp.concatenate([z2, jnp.mean(y_even, axis=0, keepdims=True), z2], axis=1),
               jnp.concatenate([z2, jnp.mean(y_odd, axis=0, keepdims=True), z2], axis=1))
    max_pad = (jnp.concatenate([z2, jnp.max(y_even, axis=0, keepdims=True), z2], axis=1),
               jnp.concatenate([z2, jnp.max(y_odd, axis=0, keepdims=True), z2], axis=1))

    shift_cache = {}
    def stat_sh(kind, phase, off):   # stat row shifted by `off` within each sample
        key = (kind, phase, off)
        if key not in shift_cache:
            row = (avg_pad, max_pad)[kind][phase]                    # (1, NBL+4)
            v = row[:, 2 + off:2 + off + NBL]
            shift_cache[key] = v if off == 0 else v * masks[off]
        return shift_cache[key]

    bias_row = jnp.zeros((1, NBL), f32) + bsp
    sm0 = bias_row
    sm1 = bias_row
    for pr, col, off in EVEN_TAPS:
        sm0 = (sm0 + wsp_avg[col] * stat_sh(0, pr, off)
               + wsp_max[col] * stat_sh(1, pr, off))
    for pr, col, off in ODD_TAPS:
        sm1 = (sm1 + wsp_avg[col] * stat_sh(0, pr, off)
               + wsp_max[col] * stat_sh(1, pr, off))
    sm0 = jax.nn.sigmoid(sm0)
    sm1 = jax.nn.sigmoid(sm1)

    # ---- single lane-dense, phase-stacked store for the whole block.
    out_ref[0, :, :] = jnp.concatenate(
        [sm0 * y_even, sm1 * y_odd], axis=0).astype(out_ref.dtype)


def _pick_block_n(N, L, requested=None):
    """Largest divisor of N with NB*L <= 512 lanes, preferring >= 2 grid steps."""
    if requested is not None:
        if N % requested != 0:
            raise ValueError(f"block_n={requested} must divide N={N}")
        return requested
    best = 1
    for nb in range(1, N + 1):
        if N % nb != 0 or nb * L > 512:
            continue
        if N // nb >= 2 or N == 1:
            best = nb
    return best


def attention_deconv_bn(x, params, *, block_n=None, matmul_dtype=jnp.float32,
                        bn_eps=1e-5):
    """x: (N, C_in, L) float32.  Returns (N, C_out, 2*L) float32 (eval mode).

    matmul_dtype=jnp.bfloat16 uses the native MXU dtype on v5e/v6e/v7x (f32
    accumulation is kept); it also quantizes the input x — validate tolerance
    before enabling.
    """
    N, C_in, L = x.shape
    f32 = jnp.float32
    w_deconv = params["w_deconv"].astype(f32)            # (C_in, C_out, K) PyTorch layout
    C_out = w_deconv.shape[1]
    T = STRIDE * L

    # --- fold BatchNorm (eval) scale into the weights, deconv bias into the shift
    bn_scale = params["bn_gamma"].astype(f32) / jnp.sqrt(params["bn_var"].astype(f32) + bn_eps)
    shift = (params["bn_beta"].astype(f32)
             + (params["b_deconv"].astype(f32) - params["bn_mean"].astype(f32)) * bn_scale)

    # --- phase-split deconv weights (stride-2, padding=K//2-1):
    #     even outputs use odd taps k = 15 - 2*jj   (jj = 0..7, shift jj)
    #     odd  outputs use even taps k = 14 - 2*i   (shift jj = i+1)
    ws = w_deconv * bn_scale[None, :, None]              # (C_in, C_out, K)
    w_even = ws[:, :, 1::2][:, :, ::-1]                  # (C_in, C_out, 8)
    w_odd = ws[:, :, 0::2][:, :, ::-1]                   # (C_in, C_out, 8)
    we = jnp.transpose(w_even, (2, 0, 1))                # (8, C_in, C_out)
    wo = jnp.transpose(w_odd, (2, 0, 1))
    zblk = jnp.zeros((1, C_in, C_out), f32)
    w_even_mat = jnp.concatenate([we, zblk], axis=0).reshape(NSHIFT * C_in, C_out).T
    w_odd_mat = jnp.concatenate([zblk, wo], axis=0).reshape(NSHIFT * C_in, C_out).T
    w_all = jnp.concatenate([w_even_mat, w_odd_mat], axis=0).astype(matmul_dtype)
    shift_all = jnp.concatenate([shift, shift], axis=0).reshape(2 * C_out, 1)

    # --- halo-pad the input (no zero-dilated input is ever materialized)
    xp = jnp.pad(x.astype(matmul_dtype), ((0, 0), (0, 0), (HALO, HALO)))
    Lp = L + 2 * HALO

    NB = _pick_block_n(N, L, block_n)
    B = N // NB
    NBL = NB * L
    smem = pl.BlockSpec(memory_space=pltpu.MemorySpace.SMEM)

    out_k = pl.pallas_call(
        attention_deconv_bn_kernel,
        out_shape=jax.ShapeDtypeStruct((B, 2 * C_out, NBL), f32),
        grid=(B,),
        in_specs=[
            pl.BlockSpec((NB, C_in, Lp), lambda b: (b, 0, 0)),
            pl.BlockSpec((2 * C_out, NSHIFT * C_in), lambda b: (0, 0)),
            pl.BlockSpec((2 * C_out, 1), lambda b: (0, 0)),
            smem,   # w_ch  (3,)
            smem,   # b_ch  (1,)
            smem,   # w_sp  (2, 7)
            smem,   # b_sp  (1,)
        ],
        out_specs=pl.BlockSpec((1, 2 * C_out, NBL), lambda b: (b, 0, 0)),
        scratch_shapes=[pltpu.VMEM((NSHIFT * C_in, NBL), matmul_dtype)],
        compiler_params=pltpu.CompilerParams(dimension_semantics=("parallel",)),
    )(
        xp,
        w_all,
        shift_all,
        params["w_ch"][0, 0].astype(f32),
        params["b_ch"].astype(f32),
        params["w_sp"][0].astype(f32),
        params["b_sp"].astype(f32),
    )

    # un-flatten: out_k[b, p*C_out + c, s*L + m] -> out[b*NB + s, c, 2m + p]
    out = out_k.reshape(B, 2, C_out, NB, L)
    out = jnp.transpose(out, (0, 3, 2, 4, 1))             # (B, NB, C_out, L, 2)
    return out.reshape(N, C_out, T)


def reference(x, params):
    """Independent pure-JAX reference (eval-mode forward)."""
    N, C_in, L = x.shape
    w_deconv = params["w_deconv"]
    C_out = w_deconv.shape[1]
    K, s = K_DECONV, STRIDE
    pad = K // 2 - 1
    # ConvTranspose1d via lhs-dilated correlation with flipped kernel
    w_flip = jnp.transpose(w_deconv[:, :, ::-1], (1, 0, 2))     # (C_out, C_in, K)
    y = lax.conv_general_dilated(
        x, w_flip, window_strides=(1,),
        padding=[(K - 1 - pad, K - 1 - pad)],
        lhs_dilation=(s,),
        dimension_numbers=("NCH", "OIH", "NCH"),
    ) + params["b_deconv"][None, :, None]
    # BatchNorm1d (eval)
    eps = 1e-5
    y = (y - params["bn_mean"][None, :, None]) / jnp.sqrt(params["bn_var"][None, :, None] + eps)
    y = y * params["bn_gamma"][None, :, None] + params["bn_beta"][None, :, None]
    # LeakyReLU; Dropout(eval) = identity
    y = jnp.where(y >= 0, y, NEG_SLOPE * y)
    # channel gate
    m = jnp.mean(y, axis=2)                                     # (N, C)
    mpad = jnp.pad(m, ((0, 0), (1, 1)))
    wch = params["w_ch"][0, 0]
    cm = params["b_ch"][0] + sum(wch[k] * mpad[:, k:k + C_out] for k in range(K_CH))
    y = jax.nn.sigmoid(cm)[:, :, None] * y
    # spatial gate
    T = y.shape[-1]
    avg_ = jnp.pad(jnp.mean(y, axis=1), ((0, 0), (PAD_SP, PAD_SP)))
    max_ = jnp.pad(jnp.max(y, axis=1), ((0, 0), (PAD_SP, PAD_SP)))
    wsp = params["w_sp"][0]
    sm = params["b_sp"][0] + sum(
        wsp[0, k] * avg_[:, k:k + T] + wsp[1, k] * max_[:, k:k + T] for k in range(K_SP))
    return jax.nn.sigmoid(sm)[:, None, :] * y


if __name__ == "__main__":
    key = jax.random.PRNGKey(0)
    # signal_size=32 (=2*L), channels=4, input_chanel=4
    N, C_in, C_out, L = 4, 4, 4, 16
    keys = jax.random.split(key, 12)
    x = jax.random.normal(keys[0], (N, C_in, L), jnp.float32)
    params = {
        "w_deconv": 0.1 * jax.random.normal(keys[1], (C_in, C_out, K_DECONV), jnp.float32),
        "b_deconv": 0.1 * jax.random.normal(keys[2], (C_out,), jnp.float32),
        "bn_gamma": 1.0 + 0.1 * jax.random.normal(keys[3], (C_out,), jnp.float32),
        "bn_beta":  0.1 * jax.random.normal(keys[4], (C_out,), jnp.float32),
        "bn_mean":  0.1 * jax.random.normal(keys[5], (C_out,), jnp.float32),
        "bn_var":   jax.random.uniform(keys[6], (C_out,), jnp.float32, 0.5, 1.5),
        "w_ch": 0.3 * jax.random.normal(keys[7], (1, 1, K_CH), jnp.float32),
        "b_ch": 0.1 * jax.random.normal(keys[8], (1,), jnp.float32),
        "w_sp": 0.3 * jax.random.normal(keys[9], (1, 2, K_SP), jnp.float32),
        "b_sp": 0.1 * jax.random.normal(keys[10], (1,), jnp.float32),
    }

    out = jax.block_until_ready(attention_deconv_bn(x, params))
    ref = jax.block_until_ready(reference(x, params))
    np.testing.assert_allclose(np.asarray(out), np.asarray(ref), rtol=2e-3, atol=2e-3)
    print("KERNEL_OK")
</pallas_src>

<mosaic_0001>
module attributes {stable_mosaic.version = 11 : i64} {
  func.func @attention_deconv_bn_kernel(%arg0: i32, %arg1: memref<2x4x24xf32, #tpu.memory_space<vmem>>, %arg2: memref<8x36xf32, #tpu.memory_space<vmem>>, %arg3: memref<8x1xf32, #tpu.memory_space<vmem>>, %arg4: memref<3xf32, #tpu.memory_space<smem>>, %arg5: memref<1xf32, #tpu.memory_space<smem>>, %arg6: memref<2x7xf32, #tpu.memory_space<smem>>, %arg7: memref<1xf32, #tpu.memory_space<smem>>, %arg8: memref<1x8x32xf32, #tpu.memory_space<vmem>>, %arg9: memref<36x32xf32, #tpu.memory_space<vmem>>) attributes {dimension_semantics = [#tpu.dimension_semantics<parallel>], iteration_bounds = array<i64: 2>, scalar_prefetch = 0 : i64, scratch_operands = 1 : i64, tpu.core_type = #tpu.core_type<tc>, window_params = [{transform_indices = @transform_0, window_bounds = array<i64: 2, 4, 24>}, {pipeline_mode = #tpu.pipeline_mode<synchronous>, transform_indices = @transform_1, window_bounds = array<i64: 8, 36>}, {pipeline_mode = #tpu.pipeline_mode<synchronous>, transform_indices = @transform_2, window_bounds = array<i64: 8, 1>}, {transform_indices = @transform_3, window_bounds = array<i64: 3>}, {transform_indices = @transform_4, window_bounds = array<i64: 1>}, {transform_indices = @transform_5, window_bounds = array<i64: 2, 7>}, {transform_indices = @transform_6, window_bounds = array<i64: 1>}, {transform_indices = @transform_7, window_bounds = array<i64: 1, 8, 32>}]} {
    %c0 = arith.constant 0 : index
    %0 = memref.load %arg4[%c0] : memref<3xf32, #tpu.memory_space<smem>>
    %c1 = arith.constant 1 : index
    %1 = memref.load %arg4[%c1] : memref<3xf32, #tpu.memory_space<smem>>
    %c2 = arith.constant 2 : index
    %2 = memref.load %arg4[%c2] : memref<3xf32, #tpu.memory_space<smem>>
    %c0_0 = arith.constant 0 : index
    %3 = memref.load %arg5[%c0_0] : memref<1xf32, #tpu.memory_space<smem>>
    %c0_1 = arith.constant 0 : index
    %c0_2 = arith.constant 0 : index
    %4 = memref.load %arg6[%c0_1, %c0_2] : memref<2x7xf32, #tpu.memory_space<smem>>
    %c0_3 = arith.constant 0 : index
    %c1_4 = arith.constant 1 : index
    %5 = memref.load %arg6[%c0_3, %c1_4] : memref<2x7xf32, #tpu.memory_space<smem>>
    %c0_5 = arith.constant 0 : index
    %c2_6 = arith.constant 2 : index
    %6 = memref.load %arg6[%c0_5, %c2_6] : memref<2x7xf32, #tpu.memory_space<smem>>
    %c0_7 = arith.constant 0 : index
    %c3 = arith.constant 3 : index
    %7 = memref.load %arg6[%c0_7, %c3] : memref<2x7xf32, #tpu.memory_space<smem>>
    %c0_8 = arith.constant 0 : index
    %c4 = arith.constant 4 : index
    %8 = memref.load %arg6[%c0_8, %c4] : memref<2x7xf32, #tpu.memory_space<smem>>
    %c0_9 = arith.constant 0 : index
    %c5 = arith.constant 5 : index
    %9 = memref.load %arg6[%c0_9, %c5] : memref<2x7xf32, #tpu.memory_space<smem>>
    %c0_10 = arith.constant 0 : index
    %c6 = arith.constant 6 : index
    %10 = memref.load %arg6[%c0_10, %c6] : memref<2x7xf32, #tpu.memory_space<smem>>
    %c1_11 = arith.constant 1 : index
    %c0_12 = arith.constant 0 : index
    %11 = memref.load %arg6[%c1_11, %c0_12] : memref<2x7xf32, #tpu.memory_space<smem>>
    %c1_13 = arith.constant 1 : index
    %c1_14 = arith.constant 1 : index
    %12 = memref.load %arg6[%c1_13, %c1_14] : memref<2x7xf32, #tpu.memory_space<smem>>
    %c1_15 = arith.constant 1 : index
    %c2_16 = arith.constant 2 : index
    %13 = memref.load %arg6[%c1_15, %c2_16] : memref<2x7xf32, #tpu.memory_space<smem>>
    %c1_17 = arith.constant 1 : index
    %c3_18 = arith.constant 3 : index
    %14 = memref.load %arg6[%c1_17, %c3_18] : memref<2x7xf32, #tpu.memory_space<smem>>
    %c1_19 = arith.constant 1 : index
    %c4_20 = arith.constant 4 : index
    %15 = memref.load %arg6[%c1_19, %c4_20] : memref<2x7xf32, #tpu.memory_space<smem>>
    %c1_21 = arith.constant 1 : index
    %c5_22 = arith.constant 5 : index
    %16 = memref.load %arg6[%c1_21, %c5_22] : memref<2x7xf32, #tpu.memory_space<smem>>
    %c1_23 = arith.constant 1 : index
    %c6_24 = arith.constant 6 : index
    %17 = memref.load %arg6[%c1_23, %c6_24] : memref<2x7xf32, #tpu.memory_space<smem>>
    %c0_25 = arith.constant 0 : index
    %18 = memref.load %arg7[%c0_25] : memref<1xf32, #tpu.memory_space<smem>>
    %cst = arith.constant 1.000000e+00 : f32
    %19 = vector.broadcast %cst : f32 to vector<1x16xf32>
    %c0_26 = arith.constant 0 : index
    %c0_27 = arith.constant 0 : index
    %c0_28 = arith.constant 0 : index
    %20 = vector.load %arg1[%c0_26, %c0_27, %c0_28] : memref<2x4x24xf32, #tpu.memory_space<vmem>>, vector<1x4x16xf32>
    %21 = vector.shape_cast %20 : vector<1x4x16xf32> to vector<4x16xf32>
    %c0_29 = arith.constant 0 : index
    %c0_30 = arith.constant 0 : index
    %22 = vector.load %arg9[%c0_29, %c0_30] : memref<36x32xf32, #tpu.memory_space<vmem>>, vector<4x16xf32>
    tpu.vector_store %arg9[%c0_29, %c0_30], %21 {strides = array<i32>} : memref<36x32xf32, #tpu.memory_space<vmem>>, vector<4x16xf32>,
    %c0_31 = arith.constant 0 : index
    %c0_32 = arith.constant 0 : index
    %c1_33 = arith.constant 1 : index
    %23 = vector.load %arg1[%c0_31, %c0_32, %c1_33] : memref<2x4x24xf32, #tpu.memory_space<vmem>>, vector<1x4x16xf32>
    %24 = vector.shape_cast %23 : vector<1x4x16xf32> to vector<4x16xf32>
    %c4_34 = arith.constant 4 : index
    %c0_35 = arith.constant 0 : index
    %25 = vector.load %arg9[%c4_34, %c0_35] : memref<36x32xf32, #tpu.memory_space<vmem>>, vector<4x16xf32>
    tpu.vector_store %arg9[%c4_34, %c0_35], %24 {strides = array<i32>} : memref<36x32xf32, #tpu.memory_space<vmem>>, vector<4x16xf32>,
    %c0_36 = arith.constant 0 : index
    %c0_37 = arith.constant 0 : index
    %c2_38 = arith.constant 2 : index
    %26 = vector.load %arg1[%c0_36, %c0_37, %c2_38] : memref<2x4x24xf32, #tpu.memory_space<vmem>>, vector<1x4x16xf32>
    %27 = vector.shape_cast %26 : vector<1x4x16xf32> to vector<4x16xf32>
    %c8 = arith.constant 8 : index
    %c0_39 = arith.constant 0 : index
    %28 = vector.load %arg9[%c8, %c0_39] : memref<36x32xf32, #tpu.memory_space<vmem>>, vector<4x16xf32>
    tpu.vector_store %arg9[%c8, %c0_39], %27 {strides = array<i32>} : memref<36x32xf32, #tpu.memory_space<vmem>>, vector<4x16xf32>,
    %c0_40 = arith.constant 0 : index
    %c0_41 = arith.constant 0 : index
    %c3_42 = arith.constant 3 : index
    %29 = vector.load %arg1[%c0_40, %c0_41, %c3_42] : memref<2x4x24xf32, #tpu.memory_space<vmem>>, vector<1x4x16xf32>
    %30 = vector.shape_cast %29 : vector<1x4x16xf32> to vector<4x16xf32>
    %c12 = arith.constant 12 : index
    %c0_43 = arith.constant 0 : index
    %31 = vector.load %arg9[%c12, %c0_43] : memref<36x32xf32, #tpu.memory_space<vmem>>, vector<4x16xf32>
    tpu.vector_store %arg9[%c12, %c0_43], %30 {strides = array<i32>} : memref<36x32xf32, #tpu.memory_space<vmem>>, vector<4x16xf32>,
    %c0_44 = arith.constant 0 : index
    %c0_45 = arith.constant 0 : index
    %c4_46 = arith.constant 4 : index
    %32 = vector.load %arg1[%c0_44, %c0_45, %c4_46] : memref<2x4x24xf32, #tpu.memory_space<vmem>>, vector<1x4x16xf32>
    %33 = vector.shape_cast %32 : vector<1x4x16xf32> to vector<4x16xf32>
    %c16 = arith.constant 16 : index
    %c0_47 = arith.constant 0 : index
    %34 = vector.load %arg9[%c16, %c0_47] : memref<36x32xf32, #tpu.memory_space<vmem>>, vector<4x16xf32>
    tpu.vector_store %arg9[%c16, %c0_47], %33 {strides = array<i32>} : memref<36x32xf32, #tpu.memory_space<vmem>>, vector<4x16xf32>,
    %c0_48 = arith.constant 0 : index
    %c0_49 = arith.constant 0 : index
    %c5_50 = arith.constant 5 : index
    %35 = vector.load %arg1[%c0_48, %c0_49, %c5_50] : memref<2x4x24xf32, #tpu.memory_space<vmem>>, vector<1x4x16xf32>
    %36 = vector.shape_cast %35 : vector<1x4x16xf32> to vector<4x16xf32>
    %c20 = arith.constant 20 : index
    %c0_51 = arith.constant 0 : index
    %37 = vector.load %arg9[%c20, %c0_51] : memref<36x32xf32, #tpu.memory_space<vmem>>, vector<4x16xf32>
    tpu.vector_store %arg9[%c20, %c0_51], %36 {strides = array<i32>} : memref<36x32xf32, #tpu.memory_space<vmem>>, vector<4x16xf32>,
    %c0_52 = arith.constant 0 : index
    %c0_53 = arith.constant 0 : index
    %c6_54 = arith.constant 6 : index
    %38 = vector.load %arg1[%c0_52, %c0_53, %c6_54] : memref<2x4x24xf32, #tpu.memory_space<vmem>>, vector<1x4x16xf32>
    %39 = vector.shape_cast %38 : vector<1x4x16xf32> to vector<4x16xf32>
    %c24 = arith.constant 24 : index
    %c0_55 = arith.constant 0 : index
    %40 = vector.load %arg9[%c24, %c0_55] : memref<36x32xf32, #tpu.memory_space<vmem>>, vector<4x16xf32>
    tpu.vector_store %arg9[%c24, %c0_55], %39 {strides = array<i32>} : memref<36x32xf32, #tpu.memory_space<vmem>>, vector<4x16xf32>,
    %c0_56 = arith.constant 0 : index
    %c0_57 = arith.constant 0 : index
    %c7 = arith.constant 7 : index
    %41 = vector.load %arg1[%c0_56, %c0_57, %c7] : memref<2x4x24xf32, #tpu.memory_space<vmem>>, vector<1x4x16xf32>
    %42 = vector.shape_cast %41 : vector<1x4x16xf32> to vector<4x16xf32>
    %c28 = arith.constant 28 : index
    %c0_58 = arith.constant 0 : index
    %43 = vector.load %arg9[%c28, %c0_58] : memref<36x32xf32, #tpu.memory_space<vmem>>, vector<4x16xf32>
    tpu.vector_store %arg9[%c28, %c0_58], %42 {strides = array<i32>} : memref<36x32xf32, #tpu.memory_space<vmem>>, vector<4x16xf32>,
    %c0_59 = arith.constant 0 : index
    %c0_60 = arith.constant 0 : index
    %c8_61 = arith.constant 8 : index
    %44 = vector.load %arg1[%c0_59, %c0_60, %c8_61] : memref<2x4x24xf32, #tpu.memory_space<vmem>>, vector<1x4x16xf32>
    %45 = vector.shape_cast %44 : vector<1x4x16xf32> to vector<4x16xf32>
    %c32 = arith.constant 32 : index
    %c0_62 = arith.constant 0 : index
    %46 = vector.load %arg9[%c32, %c0_62] : memref<36x32xf32, #tpu.memory_space<vmem>>, vector<4x16xf32>
    tpu.vector_store %arg9[%c32, %c0_62], %45 {strides = array<i32>} : memref<36x32xf32, #tpu.memory_space<vmem>>, vector<4x16xf32>,
    %c1_63 = arith.constant 1 : index
    %c0_64 = arith.constant 0 : index
    %c0_65 = arith.constant 0 : index
    %47 = vector.load %arg1[%c1_63, %c0_64, %c0_65] : memref<2x4x24xf32, #tpu.memory_space<vmem>>, vector<1x4x16xf32>
    %48 = vector.shape_cast %47 : vector<1x4x16xf32> to vector<4x16xf32>
    %c0_66 = arith.constant 0 : index
    %c16_67 = arith.constant 16 : index
    %49 = vector.load %arg9[%c0_66, %c16_67] : memref<36x32xf32, #tpu.memory_space<vmem>>, vector<4x16xf32>
    tpu.vector_store %arg9[%c0_66, %c16_67], %48 {strides = array<i32>} : memref<36x32xf32, #tpu.memory_space<vmem>>, vector<4x16xf32>,
    %c1_68 = arith.constant 1 : index
    %c0_69 = arith.constant 0 : index
    %c1_70 = arith.constant 1 : index
    %50 = vector.load %arg1[%c1_68, %c0_69, %c1_70] : memref<2x4x24xf32, #tpu.memory_space<vmem>>, vector<1x4x16xf32>
    %51 = vector.shape_cast %50 : vector<1x4x16xf32> to vector<4x16xf32>
    %c4_71 = arith.constant 4 : index
    %c16_72 = arith.constant 16 : index
    %52 = vector.load %arg9[%c4_71, %c16_72] : memref<36x32xf32, #tpu.memory_space<vmem>>, vector<4x16xf32>
    tpu.vector_store %arg9[%c4_71, %c16_72], %51 {strides = array<i32>} : memref<36x32xf32, #tpu.memory_space<vmem>>, vector<4x16xf32>,
    %c1_73 = arith.constant 1 : index
    %c0_74 = arith.constant 0 : index
    %c2_75 = arith.constant 2 : index
    %53 = vector.load %arg1[%c1_73, %c0_74, %c2_75] : memref<2x4x24xf32, #tpu.memory_space<vmem>>, vector<1x4x16xf32>
    %54 = vector.shape_cast %53 : vector<1x4x16xf32> to vector<4x16xf32>
    %c8_76 = arith.constant 8 : index
    %c16_77 = arith.constant 16 : index
    %55 = vector.load %arg9[%c8_76, %c16_77] : memref<36x32xf32, #tpu.memory_space<vmem>>, vector<4x16xf32>
    tpu.vector_store %arg9[%c8_76, %c16_77], %54 {strides = array<i32>} : memref<36x32xf32, #tpu.memory_space<vmem>>, vector<4x16xf32>,
    %c1_78 = arith.constant 1 : index
    %c0_79 = arith.constant 0 : index
    %c3_80 = arith.constant 3 : index
    %56 = vector.load %arg1[%c1_78, %c0_79, %c3_80] : memref<2x4x24xf32, #tpu.memory_space<vmem>>, vector<1x4x16xf32>
    %57 = vector.shape_cast %56 : vector<1x4x16xf32> to vector<4x16xf32>
    %c12_81 = arith.constant 12 : index
    %c16_82 = arith.constant 16 : index
    %58 = vector.load %arg9[%c12_81, %c16_82] : memref<36x32xf32, #tpu.memory_space<vmem>>, vector<4x16xf32>
    tpu.vector_store %arg9[%c12_81, %c16_82], %57 {strides = array<i32>} : memref<36x32xf32, #tpu.memory_space<vmem>>, vector<4x16xf32>,
    %c1_83 = arith.constant 1 : index
    %c0_84 = arith.constant 0 : index
    %c4_85 = arith.constant 4 : index
    %59 = vector.load %arg1[%c1_83, %c0_84, %c4_85] : memref<2x4x24xf32, #tpu.memory_space<vmem>>, vector<1x4x16xf32>
    %60 = vector.shape_cast %59 : vector<1x4x16xf32> to vector<4x16xf32>
    %c16_86 = arith.constant 16 : index
    %c16_87 = arith.constant 16 : index
    %61 = vector.load %arg9[%c16_86, %c16_87] : memref<36x32xf32, #tpu.memory_space<vmem>>, vector<4x16xf32>
    tpu.vector_store %arg9[%c16_86, %c16_87], %60 {strides = array<i32>} : memref<36x32xf32, #tpu.memory_space<vmem>>, vector<4x16xf32>,
    %c1_88 = arith.constant 1 : index
    %c0_89 = arith.constant 0 : index
    %c5_90 = arith.constant 5 : index
    %62 = vector.load %arg1[%c1_88, %c0_89, %c5_90] : memref<2x4x24xf32, #tpu.memory_space<vmem>>, vector<1x4x16xf32>
    %63 = vector.shape_cast %62 : vector<1x4x16xf32> to vector<4x16xf32>
    %c20_91 = arith.constant 20 : index
    %c16_92 = arith.constant 16 : index
    %64 = vector.load %arg9[%c20_91, %c16_92] : memref<36x32xf32, #tpu.memory_space<vmem>>, vector<4x16xf32>
    tpu.vector_store %arg9[%c20_91, %c16_92], %63 {strides = array<i32>} : memref<36x32xf32, #tpu.memory_space<vmem>>, vector<4x16xf32>,
    %c1_93 = arith.constant 1 : index
    %c0_94 = arith.constant 0 : index
    %c6_95 = arith.constant 6 : index
    %65 = vector.load %arg1[%c1_93, %c0_94, %c6_95] : memref<2x4x24xf32, #tpu.memory_space<vmem>>, vector<1x4x16xf32>
    %66 = vector.shape_cast %65 : vector<1x4x16xf32> to vector<4x16xf32>
    %c24_96 = arith.constant 24 : index
    %c16_97 = arith.constant 16 : index
    %67 = vector.load %arg9[%c24_96, %c16_97] : memref<36x32xf32, #tpu.memory_space<vmem>>, vector<4x16xf32>
    tpu.vector_store %arg9[%c24_96, %c16_97], %66 {strides = array<i32>} : memref<36x32xf32, #tpu.memory_space<vmem>>, vector<4x16xf32>,
    %c1_98 = arith.constant 1 : index
    %c0_99 = arith.constant 0 : index
    %c7_100 = arith.constant 7 : index
    %68 = vector.load %arg1[%c1_98, %c0_99, %c7_100] : memref<2x4x24xf32, #tpu.memory_space<vmem>>, vector<1x4x16xf32>
    %69 = vector.shape_cast %68 : vector<1x4x16xf32> to vector<4x16xf32>
    %c28_101 = arith.constant 28 : index
    %c16_102 = arith.constant 16 : index
    %70 = vector.load %arg9[%c28_101, %c16_102] : memref<36x32xf32, #tpu.memory_space<vmem>>, vector<4x16xf32>
    tpu.vector_store %arg9[%c28_101, %c16_102], %69 {strides = array<i32>} : memref<36x32xf32, #tpu.memory_space<vmem>>, vector<4x16xf32>,
    %c1_103 = arith.constant 1 : index
    %c0_104 = arith.constant 0 : index
    %c8_105 = arith.constant 8 : index
    %71 = vector.load %arg1[%c1_103, %c0_104, %c8_105] : memref<2x4x24xf32, #tpu.memory_space<vmem>>, vector<1x4x16xf32>
    %72 = vector.shape_cast %71 : vector<1x4x16xf32> to vector<4x16xf32>
    %c32_106 = arith.constant 32 : index
    %c16_107 = arith.constant 16 : index
    %73 = vector.load %arg9[%c32_106, %c16_107] : memref<36x32xf32, #tpu.memory_space<vmem>>, vector<4x16xf32>
    tpu.vector_store %arg9[%c32_106, %c16_107], %72 {strides = array<i32>} : memref<36x32xf32, #tpu.memory_space<vmem>>, vector<4x16xf32>,
    %c0_108 = arith.constant 0 : index
    %c0_109 = arith.constant 0 : index
    %74 = vector.load %arg2[%c0_108, %c0_109] : memref<8x36xf32, #tpu.memory_space<vmem>>, vector<8x36xf32>
    %c0_110 = arith.constant 0 : index
    %c0_111 = arith.constant 0 : index
    %75 = vector.load %arg9[%c0_110, %c0_111] : memref<36x32xf32, #tpu.memory_space<vmem>>, vector<36x32xf32>
    %cst_112 = arith.constant dense<0.000000e+00> : vector<8x32xf32>
    %76 = tpu.matmul %74, %75, %cst_112 {dimension_numbers = #tpu.dot_dimension_numbers<[1], [0], [0], [1], [0, 0, 1, 1], [], []>} : vector<8x36xf32>, vector<36x32xf32>, vector<8x32xf32> -> vector<8x32xf32>
    %c0_113 = arith.constant 0 : index
    %c0_114 = arith.constant 0 : index
    %77 = vector.load %arg3[%c0_113, %c0_114] : memref<8x1xf32, #tpu.memory_space<vmem>>, vector<8x1xf32>
    %78 = vector.broadcast %77 : vector<8x1xf32> to vector<8x32xf32>
    %79 = arith.addf %76, %78 : vector<8x32xf32>
    %cst_115 = arith.constant 0.000000e+00 : f32
    %80 = vector.broadcast %cst_115 : f32 to vector<8x32xf32>
    %81 = arith.cmpf oge, %79, %80 : vector<8x32xf32>
    %cst_116 = arith.constant 0.00999999977 : f32
    %82 = vector.broadcast %cst_116 : f32 to vector<8x32xf32>
    %83 = arith.mulf %82, %79 : vector<8x32xf32>
    %84 = arith.select %81, %79, %83 : vector<8x32xi1>, vector<8x32xf32>
    %85 = vector.extract_strided_slice %84 {offsets = [0, 0], sizes = [4, 32], strides = [1, 1]} : vector<8x32xf32> to vector<4x32xf32>
    %86 = vector.extract_strided_slice %84 {offsets = [4, 0], sizes = [4, 32], strides = [1, 1]} : vector<8x32xf32> to vector<4x32xf32>
    %87 = arith.addf %85, %86 : vector<4x32xf32>
    %88 = vector.extract_strided_slice %87 {offsets = [0, 0], sizes = [4, 16], strides = [1, 1]} : vector<4x32xf32> to vector<4x16xf32>
    %cst_117 = arith.constant dense<0.000000e+00> : vector<4xf32>
    %89 = vector.multi_reduction <add>, %88, %cst_117 [1] : vector<4x16xf32> to vector<4xf32>
    %90 = vector.shape_cast %89 : vector<4xf32> to vector<4x1xf32>
    %91 = vector.extract_strided_slice %87 {offsets = [0, 16], sizes = [4, 16], strides = [1, 1]} : vector<4x32xf32> to vector<4x16xf32>
    %cst_118 = arith.constant dense<0.000000e+00> : vector<4xf32>
    %92 = vector.multi_reduction <add>, %91, %cst_118 [1] : vector<4x16xf32> to vector<4xf32>
    %93 = vector.shape_cast %92 : vector<4xf32> to vector<4x1xf32>
    %94 = tpu.concatenate %90, %93 in 1 : vector<4x1xf32>, vector<4x1xf32> -> vector<4x2xf32>
    %cst_119 = arith.constant 3.125000e-02 : f32
    %95 = vector.broadcast %cst_119 : f32 to vector<4x2xf32>
    %96 = arith.mulf %94, %95 : vector<4x2xf32>
    %cst_120 = arith.constant 0.000000e+00 : f32
    %97 = vector.broadcast %cst_120 : f32 to vector<1x2xf32>
    %98 = tpu.concatenate %97, %96, %97 in 0 : vector<1x2xf32>, vector<4x2xf32>, vector<1x2xf32> -> vector<6x2xf32>
    %99 = vector.extract_strided_slice %98 {offsets = [0, 0], sizes = [4, 2], strides = [1, 1]} : vector<6x2xf32> to vector<4x2xf32>
    %100 = vector.broadcast %0 : f32 to vector<4x2xf32>
    %101 = arith.mulf %100, %99 : vector<4x2xf32>
    %102 = vector.broadcast %3 : f32 to vector<4x2xf32>
    %103 = arith.addf %102, %101 : vector<4x2xf32>
    %104 = vector.extract_strided_slice %98 {offsets = [1, 0], sizes = [4, 2], strides = [1, 1]} : vector<6x2xf32> to vector<4x2xf32>
    %105 = vector.broadcast %1 : f32 to vector<4x2xf32>
    %106 = arith.mulf %105, %104 : vector<4x2xf32>
    %107 = arith.addf %103, %106 : vector<4x2xf32>
    %108 = vector.extract_strided_slice %98 {offsets = [2, 0], sizes = [4, 2], strides = [1, 1]} : vector<6x2xf32> to vector<4x2xf32>
    %109 = vector.broadcast %2 : f32 to vector<4x2xf32>
    %110 = arith.mulf %109, %108 : vector<4x2xf32>
    %111 = arith.addf %107, %110 : vector<4x2xf32>
    %112 = arith.negf %111 : vector<4x2xf32>
    %113 = math.exp %112 : vector<4x2xf32>
    %cst_121 = arith.constant 1.000000e+00 : f32
    %114 = vector.broadcast %cst_121 : f32 to vector<4x2xf32>
    %115 = arith.addf %114, %113 : vector<4x2xf32>
    %116 = arith.divf %114, %115 : vector<4x2xf32>
    %117 = vector.extract_strided_slice %116 {offsets = [0, 0], sizes = [4, 1], strides = [1, 1]} : vector<4x2xf32> to vector<4x1xf32>
    %118 = vector.broadcast %117 : vector<4x1xf32> to vector<4x16xf32>
    %119 = vector.broadcast %19 : vector<1x16xf32> to vector<4x16xf32>
    %120 = arith.mulf %118, %119 : vector<4x16xf32>
    %121 = vector.extract_strided_slice %116 {offsets = [0, 1], sizes = [4, 1], strides = [1, 1]} : vector<4x2xf32> to vector<4x1xf32>
    %122 = vector.broadcast %121 : vector<4x1xf32> to vector<4x16xf32>
    %123 = vector.broadcast %19 : vector<1x16xf32> to vector<4x16xf32>
    %124 = arith.mulf %122, %123 : vector<4x16xf32>
    %125 = tpu.concatenate %120, %124 in 1 : vector<4x16xf32>, vector<4x16xf32> -> vector<4x32xf32>
    %126 = arith.mulf %125, %85 : vector<4x32xf32>
    %127 = arith.mulf %125, %86 : vector<4x32xf32>
    %128 = tpu.iota {dimensions = array<i32: 1>} : vector<1x16xi32>
    %c-2_i32 = arith.constant -2 : i32
    %129 = vector.broadcast %c-2_i32 : i32 to vector<1x16xi32>
    %130 = arith.addi %128, %129 : vector<1x16xi32>
    %c0_i32 = arith.constant 0 : i32
    %131 = vector.broadcast %c0_i32 : i32 to vector<1x16xi32>
    %132 = arith.cmpi sge, %130, %131 : vector<1x16xi32>
    %c-2_i32_122 = arith.constant -2 : i32
    %133 = vector.broadcast %c-2_i32_122 : i32 to vector<1x16xi32>
    %134 = arith.addi %128, %133 : vector<1x16xi32>
    %c16_i32 = arith.constant 16 : i32
    %135 = vector.broadcast %c16_i32 : i32 to vector<1x16xi32>
    %136 = arith.cmpi slt, %134, %135 : vector<1x16xi32>
    %137 = arith.andi %132, %136 : vector<1x16xi1>
    %138 = arith.extui %137 : vector<1x16xi1> to vector<1x16xi32>
    %139 = arith.sitofp %138 : vector<1x16xi32> to vector<1x16xf32>
    %140 = tpu.concatenate %139, %139 in 1 : vector<1x16xf32>, vector<1x16xf32> -> vector<1x32xf32>
    %c-1_i32 = arith.constant -1 : i32
    %141 = vector.broadcast %c-1_i32 : i32 to vector<1x16xi32>
    %142 = arith.addi %128, %141 : vector<1x16xi32>
    %c0_i32_123 = arith.constant 0 : i32
    %143 = vector.broadcast %c0_i32_123 : i32 to vector<1x16xi32>
    %144 = arith.cmpi sge, %142, %143 : vector<1x16xi32>
    %c-1_i32_124 = arith.constant -1 : i32
    %145 = vector.broadcast %c-1_i32_124 : i32 to vector<1x16xi32>
    %146 = arith.addi %128, %145 : vector<1x16xi32>
    %c16_i32_125 = arith.constant 16 : i32
    %147 = vector.broadcast %c16_i32_125 : i32 to vector<1x16xi32>
    %148 = arith.cmpi slt, %146, %147 : vector<1x16xi32>
    %149 = arith.andi %144, %148 : vector<1x16xi1>
    %150 = arith.extui %149 : vector<1x16xi1> to vector<1x16xi32>
    %151 = arith.sitofp %150 : vector<1x16xi32> to vector<1x16xf32>
    %152 = tpu.concatenate %151, %151 in 1 : vector<1x16xf32>, vector<1x16xf32> -> vector<1x32xf32>
    %c1_i32 = arith.constant 1 : i32
    %153 = vector.broadcast %c1_i32 : i32 to vector<1x16xi32>
    %154 = arith.addi %128, %153 : vector<1x16xi32>
    %c0_i32_126 = arith.constant 0 : i32
    %155 = vector.broadcast %c0_i32_126 : i32 to vector<1x16xi32>
    %156 = arith.cmpi sge, %154, %155 : vector<1x16xi32>
    %c1_i32_127 = arith.constant 1 : i32
    %157 = vector.broadcast %c1_i32_127 : i32 to vector<1x16xi32>
    %158 = arith.addi %128, %157 : vector<1x16xi32>
    %c16_i32_128 = arith.constant 16 : i32
    %159 = vector.broadcast %c16_i32_128 : i32 to vector<1x16xi32>
    %160 = arith.cmpi slt, %158, %159 : vector<1x16xi32>
    %161 = arith.andi %156, %160 : vector<1x16xi1>
    %162 = arith.extui %161 : vector<1x16xi1> to vector<1x16xi32>
    %163 = arith.sitofp %162 : vector<1x16xi32> to vector<1x16xf32>
    %164 = tpu.concatenate %163, %163 in 1 : vector<1x16xf32>, vector<1x16xf32> -> vector<1x32xf32>
    %c2_i32 = arith.constant 2 : i32
    %165 = vector.broadcast %c2_i32 : i32 to vector<1x16xi32>
    %166 = arith.addi %128, %165 : vector<1x16xi32>
    %c0_i32_129 = arith.constant 0 : i32
    %167 = vector.broadcast %c0_i32_129 : i32 to vector<1x16xi32>
    %168 = arith.cmpi sge, %166, %167 : vector<1x16xi32>
    %c2_i32_130 = arith.constant 2 : i32
    %169 = vector.broadcast %c2_i32_130 : i32 to vector<1x16xi32>
    %170 = arith.addi %128, %169 : vector<1x16xi32>
    %c16_i32_131 = arith.constant 16 : i32
    %171 = vector.broadcast %c16_i32_131 : i32 to vector<1x16xi32>
    %172 = arith.cmpi slt, %170, %171 : vector<1x16xi32>
    %173 = arith.andi %168, %172 : vector<1x16xi1>
    %174 = arith.extui %173 : vector<1x16xi1> to vector<1x16xi32>
    %175 = arith.sitofp %174 : vector<1x16xi32> to vector<1x16xf32>
    %176 = tpu.concatenate %175, %175 in 1 : vector<1x16xf32>, vector<1x16xf32> -> vector<1x32xf32>
    %cst_132 = arith.constant 0.000000e+00 : f32
    %177 = vector.broadcast %cst_132 : f32 to vector<1x2xf32>
    %cst_133 = arith.constant dense<0.000000e+00> : vector<32xf32>
    %178 = vector.multi_reduction <add>, %126, %cst_133 [0] : vector<4x32xf32> to vector<32xf32>
    %179 = vector.shape_cast %178 : vector<32xf32> to vector<1x32xf32>
    %cst_134 = arith.constant 4.000000e+00 : f32
    %180 = vector.broadcast %cst_134 : f32 to vector<1x32xf32>
    %181 = arith.divf %179, %180 : vector<1x32xf32>
    %182 = tpu.concatenate %177, %181, %177 in 1 : vector<1x2xf32>, vector<1x32xf32>, vector<1x2xf32> -> vector<1x36xf32>
    %cst_135 = arith.constant dense<0.000000e+00> : vector<32xf32>
    %183 = vector.multi_reduction <add>, %127, %cst_135 [0] : vector<4x32xf32> to vector<32xf32>
    %184 = vector.shape_cast %183 : vector<32xf32> to vector<1x32xf32>
    %cst_136 = arith.constant 4.000000e+00 : f32
    %185 = vector.broadcast %cst_136 : f32 to vector<1x32xf32>
    %186 = arith.divf %184, %185 : vector<1x32xf32>
    %187 = tpu.concatenate %177, %186, %177 in 1 : vector<1x2xf32>, vector<1x32xf32>, vector<1x2xf32> -> vector<1x36xf32>
    %cst_137 = arith.constant dense<0xFF800000> : vector<32xf32>
    %188 = vector.multi_reduction <maximumf>, %126, %cst_137 [0] : vector<4x32xf32> to vector<32xf32>
    %189 = vector.shape_cast %188 : vector<32xf32> to vector<1x32xf32>
    %190 = tpu.concatenate %177, %189, %177 in 1 : vector<1x2xf32>, vector<1x32xf32>, vector<1x2xf32> -> vector<1x36xf32>
    %cst_138 = arith.constant dense<0xFF800000> : vector<32xf32>
    %191 = vector.multi_reduction <maximumf>, %127, %cst_138 [0] : vector<4x32xf32> to vector<32xf32>
    %192 = vector.shape_cast %191 : vector<32xf32> to vector<1x32xf32>
    %193 = tpu.concatenate %177, %192, %177 in 1 : vector<1x2xf32>, vector<1x32xf32>, vector<1x2xf32> -> vector<1x36xf32>
    %cst_139 = arith.constant 0.000000e+00 : f32
    %194 = vector.broadcast %cst_139 : f32 to vector<1x32xf32>
    %195 = vector.broadcast %18 : f32 to vector<1x32xf32>
    %196 = arith.addf %194, %195 : vector<1x32xf32>
    %197 = vector.extract_strided_slice %187 {offsets = [0, 0], sizes = [1, 32], strides = [1, 1]} : vector<1x36xf32> to vector<1x32xf32>
    %198 = arith.mulf %197, %140 : vector<1x32xf32>
    %199 = vector.broadcast %4 : f32 to vector<1x32xf32>
    %200 = arith.mulf %199, %198 : vector<1x32xf32>
    %201 = arith.addf %196, %200 : vector<1x32xf32>
    %202 = vector.extract_strided_slice %193 {offsets = [0, 0], sizes = [1, 32], strides = [1, 1]} : vector<1x36xf32> to vector<1x32xf32>
    %203 = arith.mulf %202, %140 : vector<1x32xf32>
    %204 = vector.broadcast %11 : f32 to vector<1x32xf32>
    %205 = arith.mulf %204, %203 : vector<1x32xf32>
    %206 = arith.addf %201, %205 : vector<1x32xf32>
    %207 = vector.extract_strided_slice %182 {offsets = [0, 1], sizes = [1, 32], strides = [1, 1]} : vector<1x36xf32> to vector<1x32xf32>
    %208 = arith.mulf %207, %152 : vector<1x32xf32>
    %209 = vector.broadcast %5 : f32 to vector<1x32xf32>
    %210 = arith.mulf %209, %208 : vector<1x32xf32>
    %211 = arith.addf %206, %210 : vector<1x32xf32>
    %212 = vector.extract_strided_slice %190 {offsets = [0, 1], sizes = [1, 32], strides = [1, 1]} : vector<1x36xf32> to vector<1x32xf32>
    %213 = arith.mulf %212, %152 : vector<1x32xf32>
    %214 = vector.broadcast %12 : f32 to vector<1x32xf32>
    %215 = arith.mulf %214, %213 : vector<1x32xf32>
    %216 = arith.addf %211, %215 : vector<1x32xf32>
    %217 = vector.extract_strided_slice %187 {offsets = [0, 1], sizes = [1, 32], strides = [1, 1]} : vector<1x36xf32> to vector<1x32xf32>
    %218 = arith.mulf %217, %152 : vector<1x32xf32>
    %219 = vector.broadcast %6 : f32 to vector<1x32xf32>
    %220 = arith.mulf %219, %218 : vector<1x32xf32>
    %221 = arith.addf %216, %220 : vector<1x32xf32>
    %222 = vector.extract_strided_slice %193 {offsets = [0, 1], sizes = [1, 32], strides = [1, 1]} : vector<1x36xf32> to vector<1x32xf32>
    %223 = arith.mulf %222, %152 : vector<1x32xf32>
    %224 = vector.broadcast %13 : f32 to vector<1x32xf32>
    %225 = arith.mulf %224, %223 : vector<1x32xf32>
    %226 = arith.addf %221, %225 : vector<1x32xf32>
    %227 = vector.extract_strided_slice %182 {offsets = [0, 2], sizes = [1, 32], strides = [1, 1]} : vector<1x36xf32> to vector<1x32xf32>
    %228 = vector.broadcast %7 : f32 to vector<1x32xf32>
    %229 = arith.mulf %228, %227 : vector<1x32xf32>
    %230 = arith.addf %226, %229 : vector<1x32xf32>
    %231 = vector.extract_strided_slice %190 {offsets = [0, 2], sizes = [1, 32], strides = [1, 1]} : vector<1x36xf32> to vector<1x32xf32>
    %232 = vector.broadcast %14 : f32 to vector<1x32xf32>
    %233 = arith.mulf %232, %231 : vector<1x32xf32>
    %234 = arith.addf %230, %233 : vector<1x32xf32>
    %235 = vector.extract_strided_slice %187 {offsets = [0, 2], sizes = [1, 32], strides = [1, 1]} : vector<1x36xf32> to vector<1x32xf32>
    %236 = vector.broadcast %8 : f32 to vector<1x32xf32>
    %237 = arith.mulf %236, %235 : vector<1x32xf32>
    %238 = arith.addf %234, %237 : vector<1x32xf32>
    %239 = vector.extract_strided_slice %193 {offsets = [0, 2], sizes = [1, 32], strides = [1, 1]} : vector<1x36xf32> to vector<1x32xf32>
    %240 = vector.broadcast %15 : f32 to vector<1x32xf32>
    %241 = arith.mulf %240, %239 : vector<1x32xf32>
    %242 = arith.addf %238, %241 : vector<1x32xf32>
    %243 = vector.extract_strided_slice %182 {offsets = [0, 3], sizes = [1, 32], strides = [1, 1]} : vector<1x36xf32> to vector<1x32xf32>
    %244 = arith.mulf %243, %164 : vector<1x32xf32>
    %245 = vector.broadcast %9 : f32 to vector<1x32xf32>
    %246 = arith.mulf %245, %244 : vector<1x32xf32>
    %247 = arith.addf %242, %246 : vector<1x32xf32>
    %248 = vector.extract_strided_slice %190 {offsets = [0, 3], sizes = [1, 32], strides = [1, 1]} : vector<1x36xf32> to vector<1x32xf32>
    %249 = arith.mulf %248, %164 : vector<1x32xf32>
    %250 = vector.broadcast %16 : f32 to vector<1x32xf32>
    %251 = arith.mulf %250, %249 : vector<1x32xf32>
    %252 = arith.addf %247, %251 : vector<1x32xf32>
    %253 = vector.extract_strided_slice %187 {offsets = [0, 3], sizes = [1, 32], strides = [1, 1]} : vector<1x36xf32> to vector<1x32xf32>
    %254 = arith.mulf %253, %164 : vector<1x32xf32>
    %255 = vector.broadcast %10 : f32 to vector<1x32xf32>
    %256 = arith.mulf %255, %254 : vector<1x32xf32>
    %257 = arith.addf %252, %256 : vector<1x32xf32>
    %258 = vector.extract_strided_slice %193 {offsets = [0, 3], sizes = [1, 32], strides = [1, 1]} : vector<1x36xf32> to vector<1x32xf32>
    %259 = arith.mulf %258, %164 : vector<1x32xf32>
    %260 = vector.broadcast %17 : f32 to vector<1x32xf32>
    %261 = arith.mulf %260, %259 : vector<1x32xf32>
    %262 = arith.addf %257, %261 : vector<1x32xf32>
    %263 = vector.broadcast %4 : f32 to vector<1x32xf32>
    %264 = arith.mulf %263, %208 : vector<1x32xf32>
    %265 = arith.addf %196, %264 : vector<1x32xf32>
    %266 = vector.broadcast %11 : f32 to vector<1x32xf32>
    %267 = arith.mulf %266, %213 : vector<1x32xf32>
    %268 = arith.addf %265, %267 : vector<1x32xf32>
    %269 = vector.broadcast %5 : f32 to vector<1x32xf32>
    %270 = arith.mulf %269, %218 : vector<1x32xf32>
    %271 = arith.addf %268, %270 : vector<1x32xf32>
    %272 = vector.broadcast %12 : f32 to vector<1x32xf32>
    %273 = arith.mulf %272, %223 : vector<1x32xf32>
    %274 = arith.addf %271, %273 : vector<1x32xf32>
    %275 = vector.broadcast %6 : f32 to vector<1x32xf32>
    %276 = arith.mulf %275, %227 : vector<1x32xf32>
    %277 = arith.addf %274, %276 : vector<1x32xf32>
    %278 = vector.broadcast %13 : f32 to vector<1x32xf32>
    %279 = arith.mulf %278, %231 : vector<1x32xf32>
    %280 = arith.addf %277, %279 : vector<1x32xf32>
    %281 = vector.broadcast %7 : f32 to vector<1x32xf32>
    %282 = arith.mulf %281, %235 : vector<1x32xf32>
    %283 = arith.addf %280, %282 : vector<1x32xf32>
    %284 = vector.broadcast %14 : f32 to vector<1x32xf32>
    %285 = arith.mulf %284, %239 : vector<1x32xf32>
    %286 = arith.addf %283, %285 : vector<1x32xf32>
    %287 = vector.broadcast %8 : f32 to vector<1x32xf32>
    %288 = arith.mulf %287, %244 : vector<1x32xf32>
    %289 = arith.addf %286, %288 : vector<1x32xf32>
    %290 = vector.broadcast %15 : f32 to vector<1x32xf32>
    %291 = arith.mulf %290, %249 : vector<1x32xf32>
    %292 = arith.addf %289, %291 : vector<1x32xf32>
    %293 = vector.broadcast %9 : f32 to vector<1x32xf32>
    %294 = arith.mulf %293, %254 : vector<1x32xf32>
    %295 = arith.addf %292, %294 : vector<1x32xf32>
    %296 = vector.broadcast %16 : f32 to vector<1x32xf32>
    %297 = arith.mulf %296, %259 : vector<1x32xf32>
    %298 = arith.addf %295, %297 : vector<1x32xf32>
    %299 = vector.extract_strided_slice %182 {offsets = [0, 4], sizes = [1, 32], strides = [1, 1]} : vector<1x36xf32> to vector<1x32xf32>
    %300 = arith.mulf %299, %176 : vector<1x32xf32>
    %301 = vector.broadcast %10 : f32 to vector<1x32xf32>
    %302 = arith.mulf %301, %300 : vector<1x32xf32>
    %303 = arith.addf %298, %302 : vector<1x32xf32>
    %304 = vector.extract_strided_slice %190 {offsets = [0, 4], sizes = [1, 32], strides = [1, 1]} : vector<1x36xf32> to vector<1x32xf32>
    %305 = arith.mulf %304, %176 : vector<1x32xf32>
    %306 = vector.broadcast %17 : f32 to vector<1x32xf32>
    %307 = arith.mulf %306, %305 : vector<1x32xf32>
    %308 = arith.addf %303, %307 : vector<1x32xf32>
    %309 = arith.negf %262 : vector<1x32xf32>
    %310 = math.exp %309 : vector<1x32xf32>
    %cst_140 = arith.constant 1.000000e+00 : f32
    %311 = vector.broadcast %cst_140 : f32 to vector<1x32xf32>
    %312 = arith.addf %311, %310 : vector<1x32xf32>
    %313 = arith.divf %311, %312 : vector<1x32xf32>
    %314 = arith.negf %308 : vector<1x32xf32>
    %315 = math.exp %314 : vector<1x32xf32>
    %cst_141 = arith.constant 1.000000e+00 : f32
    %316 = vector.broadcast %cst_141 : f32 to vector<1x32xf32>
    %317 = arith.addf %316, %315 : vector<1x32xf32>
    %318 = arith.divf %316, %317 : vector<1x32xf32>
    %319 = vector.broadcast %313 : vector<1x32xf32> to vector<4x32xf32>
    %320 = arith.mulf %319, %126 : vector<4x32xf32>
    %321 = vector.broadcast %318 : vector<1x32xf32> to vector<4x32xf32>
    %322 = arith.mulf %321, %127 : vector<4x32xf32>
    %323 = tpu.concatenate %320, %322 in 0 : vector<4x32xf32>, vector<4x32xf32> -> vector<8x32xf32>
    %c0_142 = arith.constant 0 : index
    %c0_143 = arith.constant 0 : index
    %c0_144 = arith.constant 0 : index
    %324 = vector.load %arg8[%c0_142, %c0_143, %c0_144] : memref<1x8x32xf32, #tpu.memory_space<vmem>>, vector<1x8x32xf32>
    %325 = vector.shape_cast %324 : vector<1x8x32xf32> to vector<8x32xf32>
    %326 = vector.shape_cast %323 : vector<8x32xf32> to vector<1x8x32xf32>
    tpu.vector_store %arg8[%c0_142, %c0_143, %c0_144], %326 {strides = array<i32>} : memref<1x8x32xf32, #tpu.memory_space<vmem>>, vector<1x8x32xf32>,
    return
  }
  func.func @transform_0(%arg0: i32) -> (i32, i32, i32) {
    %c0_i32 = arith.constant 0 : i32
    %c0_i32_0 = arith.constant 0 : i32
    %c0_i32_1 = arith.constant 0 : i32
    return %arg0, %c0_i32, %c0_i32_0 : i32, i32, i32
  }
  func.func @transform_1(%arg0: i32) -> (i32, i32) {
    %c0_i32 = arith.constant 0 : i32
    %c0_i32_0 = arith.constant 0 : i32
    %c0_i32_1 = arith.constant 0 : i32
    return %c0_i32, %c0_i32_0 : i32, i32
  }
  func.func @transform_2(%arg0: i32) -> (i32, i32) {
    %c0_i32 = arith.constant 0 : i32
    %c0_i32_0 = arith.constant 0 : i32
    %c0_i32_1 = arith.constant 0 : i32
    return %c0_i32, %c0_i32_0 : i32, i32
  }
  func.func @transform_3(%arg0: i32) -> i32 {
    %c0_i32 = arith.constant 0 : i32
    %c0_i32_0 = arith.constant 0 : i32
    return %c0_i32 : i32
  }
  func.func @transform_4(%arg0: i32) -> i32 {
    %c0_i32 = arith.constant 0 : i32
    %c0_i32_0 = arith.constant 0 : i32
    return %c0_i32 : i32
  }
  func.func @transform_5(%arg0: i32) -> (i32, i32) {
    %c0_i32 = arith.constant 0 : i32
    %c0_i32_0 = arith.constant 0 : i32
    %c0_i32_1 = arith.constant 0 : i32
    return %c0_i32, %c0_i32_0 : i32, i32
  }
  func.func @transform_6(%arg0: i32) -> i32 {
    %c0_i32 = arith.constant 0 : i32
    %c0_i32_0 = arith.constant 0 : i32
    return %c0_i32 : i32
  }
  func.func @transform_7(%arg0: i32) -> (i32, i32, i32) {
    %c0_i32 = arith.constant 0 : i32
    %c0_i32_0 = arith.constant 0 : i32
    %c0_i32_1 = arith.constant 0 : i32
    return %arg0, %c0_i32, %c0_i32_0 : i32, i32, i32
  }
}

</mosaic_0001>

<bundles_post_ra>
// kernel: tpu_custom_call.1
= control target key start
LH: loop header
LB: loop body
LE: loop exit
PB: predicated region body
PF: predicated region fallthrough
CT: control target
= control target key end

     0   :  { %s1850_s0 = inlined_call_operand.vmem [shape: f32[4,4,24], index: 0, kind: input, shape index: {}]   ;;  %s1851_s1 = inlined_call_operand.hbm [shape: f32[8,36], index: 1, kind: input, shape index: {}]   ;;  %s1852_s2 = inlined_call_operand.vmem [shape: f32[8,1], index: 2, kind: input, shape index: {}]   ;;  %s1853_s3 = inlined_call_operand.vmem [shape: f32[3], index: 3, kind: input, shape index: {}]   ;;  %s1854_s4 = inlined_call_operand.<no memory space> [shape: f32[1], index: 4, kind: input, shape index: {}]   ;;  %s1855_s5 = inlined_call_operand.vmem [shape: f32[2,7], index: 5, kind: input, shape index: {}]   ;;  %s1856_s6 = inlined_call_operand.<no memory space> [shape: f32[1], index: 6, kind: input, shape index: {}]   ;;  %s1857_s7 = inlined_call_operand.hbm [shape: f32[2,8,32], index: 7, kind: output, shape index: {}]  }
   0x1   :  { %12 = sst [smem:[#allocation3]] %s1854_s4 }
   0x2   :  { %13 = sst [smem:[#allocation4]] %s1856_s6 }
   0x3   :  { %14 = vsyncpa [#allocation6], 0 }
   0x4   :  { %15 = vsyncpa [#allocation8], 0 }
   0x5   :  { %16 = vsyncpa [#allocation11], 0 }
   0x6   :  { %17 = vsyncpa [#allocation7], 0 }
   0x7   :  { %19 = vsyncpa [#allocation7 + $0x1], 0  ;;  %s1427_s28 = smov 0   ;;  %s1429_s29 = smov 0  }
   0x8   :  { %s1431_s30 = smov 0   ;;  %s1433_s8 = smov 0  }
   0x9 LB: > { %s1448_s4 = sadd.s32 4294967295, %s1348_s8   ;;  %s1028_s6 = sadd.s32 4294967294, %s1348_s8   ;;  %s1348_s8 = sphi %s1433_s8, %s1881_s8   ;;  %s1344_s30 = sphi %s1431_s30, %s1880_s30   ;;  %s1340_s29 = sphi %s1429_s29, %s1879_s29   ;;  %s1336_s28 = sphi %s1427_s28, %s1878_s28  }
   0xa   : > { %s1452_s9 = sadd.s32 1, %s1348_s8   ;;  %s184_s10 = sadd.s32 1, %s1344_s30 }
   0xb   : > { %s181_s11 = ssub.s32 %s1348_s8, %s1452_s9  ;;  %p194_p0 = scmp.ne.s32.totalorder %s1344_s30, %s1340_s29 }
   0xc   : > { %p182_p1 = scmp.eq.s32.totalorder %s181_s11, 0  ;;  %p195_p2 = scmp.eq.s32.totalorder %s1448_s4, 1 }
   0xd   : > { %p200_p3 = scmp.ne.s32.totalorder %s1340_s29, %s1336_s28  ;;  %p201_p4 = scmp.eq.s32.totalorder %s1028_s6, 1 }
   0xe   : > { %s1463_s12 = scalar_select %p182_p1, %s1344_s30, %s184_s10  }
   0xf   : > { %p1465_p5 = por %p195_p2, %p194_p0  ;;  %p1469_p6 = por %p201_p4, %p200_p3 }
  0x10   : > { %p1029_p7 = scmp.ge.s32.totalorder %s1348_s8, 1  ;;  %p208_p8 = scmp.lt.s32.totalorder %s1348_s8, 3 }
  0x11   : > { %s1863_s13 = scalar_select %p1465_p5, 1, 0 }
  0x12   : > { %s1864_s14 = scalar_select %p1469_p6, 1, 0 }
  0x13   : > { %p1858_p9 = scmp.eq.s32.totalorder %s1448_s4, 0  ;;  %p1476_p10 = pnand %p1029_p7, %p208_p8 }
  0x14   : > { %s1350_s16 = smov [#allocation5]   ;;  %s235_s20 = sshll.u32 %s1853_s3, 4  ;;  %s1485_s20 = int_to_ptr.vmem [resolvable:$true] %s235_s20 }
  0x15   : > { %s1865_s15 = scalar_select %p1476_p10, 1, 0 }
  0x16   : > { %s221_s17 = sshll.u32 %s1350_s16, 4  ;;  %p1117_p11 = pneg %p1476_p10  ;;  %s222_s17 = int_to_ptr.vmem [resolvable:$true] %s221_s17 }
  0x17   : > { %s249_s24 = sshll.u32 %s1855_s5, 4  ;;  %s1216_s27 = scalar_lea.hbm %s1851_s1, 128  ;;  %s1496_s24 = int_to_ptr.vmem [resolvable:$true] %s249_s24 }
  0x18   : > { %p1489_p12 = pnand %p1858_p9, %p1117_p11  ;;  %p1217_p13 = scmp.ne.s32.totalorder %s1851_s1, %s1216_s27 }
  0x19   : > { %p1223_p3 = scmp.lt.u32.totalorder %s1216_s27, %s1851_s1 }
  0x1a   : > { %p1218_p0 = pneg %p1489_p12 }
  0x1c   : > { %p1219_p1 = pnand %p1218_p0, %p1217_p13 }
  0x1e   : > { %p1220_p2 = pneg %p1219_p1 }
  0x20   : > { %p1225_p4 = pnand %p1223_p3, %p1220_p2 }
  0x22   : > { %1228 = shalt.err (!%p1225_p4)
}
  0x23   : > { %s1229_s18 = scalar_lea.vmem %s222_s17, 128  ;;  %p1237_p9 = scmp.lt.s32.totalorder %s222_s17, %s222_s17 }
  0x24   : > { %p1230_p7 = scmp.ne.s32.totalorder %s222_s17, %s1229_s18  ;;  %p1238_p6 = scmp.lt.s32.totalorder %s1229_s18, %s1229_s18 }
  0x26   : > { %p1232_p8 = pnand %p1230_p7, %p1218_p0  ;;  %p1239_p5 = por %p1238_p6, %p1237_p9 }
  0x28   : > { %p1233_p11 = pneg %p1232_p8 }
  0x2a   : > { %p1240_p10 = pnand %p1239_p5, %p1233_p11 }
  0x2c   : > { %1243 = shalt.err (!%p1240_p10)
}
  0x2d   : > { %1120 = dma.hbm_to_vmem [thread:$0]  (!%p1489_p12), %s1851_s1, 128, %s222_s17, [#allocation6]  }
  0x2e   : > { %s1244_s23 = scalar_lea.vmem %s1485_s20, 16  ;;  %p1252_p6 = scmp.lt.s32.totalorder %s1485_s20, %s1485_s20 }
  0x2f   : > { %p1245_p13 = scmp.ne.s32.totalorder %s1485_s20, %s1244_s23  ;;  %p1253_p5 = scmp.lt.s32.totalorder %s1244_s23, %s1244_s23 }
  0x31   : > { %p1247_p1 = pnand %p1245_p13, %p1218_p0  ;;  %p1254_p9 = por %p1253_p5, %p1252_p6 }
  0x33   : > { %p1248_p2 = pneg %p1247_p1 }
  0x35   : > { %p1255_p10 = pnand %p1254_p9, %p1248_p2 }
  0x37   : > { %1258 = shalt.err (!%p1255_p10)
}
  0x38   : > { %s1351_s25 = smov [#allocation9]   ;;  %s1259_s17 = scalar_lea.vmem %s1496_s24, 32 }
  0x39   : > { %1123 = dma.vmem_to_smem (!%p1489_p12), %s1485_s20, 16, %s1351_s25, [#allocation8]  }
  0x3a   : > { %p1260_p3 = scmp.ne.s32.totalorder %s1496_s24, %s1259_s17  ;;  %p1267_p8 = scmp.lt.s32.totalorder %s1496_s24, %s1496_s24 }
  0x3b   : > { %p1268_p11 = scmp.lt.s32.totalorder %s1259_s17, %s1259_s17 }
  0x3c   : > { %p1262_p4 = pnand %p1260_p3, %p1218_p0 }
  0x3d   : > { %p1269_p13 = por %p1268_p11, %p1267_p8 }
  0x3e   : > { %p1263_p7 = pneg %p1262_p4 }
  0x40   : > { %p1270_p1 = pnand %p1269_p13, %p1263_p7 }
  0x42   : > { %1273 = shalt.err (!%p1270_p1)
}
  0x43   : > { %s1352_s26 = smov [#allocation10]   ;;  %p1867_p2 = scmp.ne.s32.totalorder %s1865_s15, 0 }
  0x44   : > { %1126 = dma.vmem_to_smem (!%p1489_p12), %s1496_s24, 32, %s1352_s26, [#allocation11]  }
  0x45   : > { %274 = sbr.rel (%p1867_p2) target bundleno = 1337 (0x539), region = 48  ;;  %p1868_p6 = scmp.eq.s32.totalorder (!%p1867_p2), %s1448_s4, 0 }
  0x4c   : > { %1319 = dma.done.wait (%p1868_p6), [#allocation6], 128   ;;  %p1869_p0 = pmov %p1868_p6 }
  0x4e   : > { %1321 = vsyncadd (%p1869_p0), [#allocation6], 4294967168  ;;  %p1870_p5 = pmov %p1869_p0 }
  0x4f   : > { %p1871_p9 = pmov %p1869_p0 }
  0x50   : > { %1323 = dma.done.wait (%p1870_p5), [#allocation8], 16  }
  0x51   : > { %1325 = vsyncadd (%p1871_p9), [#allocation8], 4294967280  ;;  %p1872_p10 = pmov %p1869_p0 }
  0x52   : > { %p1873_p12 = pmov %p1869_p0 }
  0x53   : > { %1327 = dma.done.wait (%p1872_p10), [#allocation11], 32  }
  0x54   : > { %1329 = vsyncadd (%p1873_p12), [#allocation11], 4294967264 }
  0x55   : > { %288 = sfence }
  0x56   : > { %s1039_s15 = sshll.u32 %s1448_s4, 1  ;;  %s1353_s6 = smov 127   ;;  %vm341_vm0 = vcmask 125952   ;;  %v1359_v9 = vmov 0.0|0.0   ;;  %vm1370_vm1 = vmmov 0   ;;  %v1371_v19 = vmov 0.0  }
  0x57   : > { %p316_p3 = scmp.lt.s32.totalorder %s1039_s15, 3  ;;  %s1354_s10 = smov 125   ;;  %1097 = vmatprep.subr.bf16.mxu0 %v1359_v9  ;;  %1094 = vmatprep.mubr.msk.f32.mxu0 %vm1370_vm1, %v1371_v19  ;;  %v453_v20 = vld [vmem:[%s1852_s2] sm:$0xff]  ;;  %v1372_v21 = vmov 0   ;;  %vm397_vm2 = vcmask 257152   ;;  %vm463_vm3 = vcmask 1043456  }
  0x58   : > { %s1355_s11 = smov 126   ;;  %s1862_s16 = smov 16   ;;  %1200 = vset.pattern.permute.xlu1 %v1372_v21  ;;  %1201 = vset.pattern.permute.xlu0 %v1372_v21  ;;  %v447_v46 = vld [vmem:[#allocation5] sm:$0xff]  ;;  %vm459_vm4 = vcmask 293888   ;;  %v1375_v58 = vmov 1   ;;  %vm554_vm6 = vcmask 7168  }
  0x59   : > { %s1883_s15 = smov (!%p316_p3, %s1039_s15), 3  ;;  %s1357_s18 = smov 15   ;;  %vm560_vm7 = vcmask 1040384   ;;  %vm562_vm8 = vcmask 1044480   ;;  %vm595_vm14 = vcmask 130048   ;;  %vm645_vm15 = vcmask 257024  }
  0x5a   : > { %s1040_s20 = sshll.u32 %s1883_s15, 2  ;;  %s1358_s19 = smov 14   ;;  %vm661_vm1 = vcmask 277504  }
  0x5b   : > { %s1558_s27 = scalar_lea.vmem %s1850_s0, %s1040_s20  ;;  %s1360_s22 = smov 13  }
  0x5c   : > { %v343_v0 = vld [vmem:[%s1558_s27] sm:$0xf]  ;;  %v1056_v3 = vld [vmem:[%s1558_s27 + $0x4] sm:$0xf]  ;;  %s1361_s23 = smov 124   ;;  %s1362_s25 = smov 123  }
  0x5d   : > { %v355_v1 = vld [vmem:[%s1558_s27] sm:$0xf]  ;;  %345 = vrot.lane.b32.xlu0 %v343_v0, %s1353_s6  ;;  %v1057_v4 = vld [vmem:[%s1558_s27 + $0x4] sm:$0xf]  ;;  %s1363_s17 = smov 122   ;;  %s1364_s26 = smov 121  }
  0x5e   : > { %357 = vrot.lane.b32.xlu1 %v355_v1, %s1354_s10  ;;  %v349_v2 = vld [vmem:[%s1558_s27] sm:$0xf]  ;;  %v1058_v5 = vld [vmem:[%s1558_s27 + $0x4] sm:$0xf]  ;;  %s1365_s15 = smov 12   ;;  %s1366_s20 = smov 11  }
  0x5f   : > { %v340_v6 = vld [vmem:[%s1558_s27] sm:$0xf]  ;;  %v1059_v7 = vld [vmem:[%s1558_s27 + $0x4] sm:$0xf]  ;;  %s1367_s21 = smov 10   ;;  %s1368_s24 = smov 9  }
  0x60   : > { %342 = vst.msk [vmem:[#allocation2] sm:$0xf] %vm341_vm0, %v340_v6  ;;  %v361_v8 = vld [vmem:[%s1558_s27] sm:$0xf]  ;;  %v1060_v13 = vld [vmem:[%s1558_s27 + $0x4] sm:$0xf] }
  0x61   : > { %351 = vrot.lane.b32.xlu0 %v349_v2, %s1355_s11  ;;  %v367_v10 = vld [vmem:[%s1558_s27] sm:$0xf]  ;;  %v1061_v14 = vld [vmem:[%s1558_s27 + $0x4] sm:$0xf]  ;;  %p1876_p7 = scmp.ne.s32.totalorder %s1863_s13, 0 }
  0x62   : > { %394 = vrot.lane.b32.xlu1 %v1056_v3, %s1862_s16  ;;  %v373_v11 = vld [vmem:[%s1558_s27] sm:$0xf]  ;;  %v1062_v15 = vld [vmem:[%s1558_s27 + $0x4] sm:$0xf] }
  0x63   : > { %v379_v12 = vld [vmem:[%s1558_s27] sm:$0xf]  ;;  %v1063_v16 = vld [vmem:[%s1558_s27 + $0x4] sm:$0xf] }
  0x64   : > { %v385_v17 = vld [vmem:[%s1558_s27] sm:$0xf]  ;;  %v1064_v18 = vld [vmem:[%s1558_s27 + $0x4] sm:$0xf]  ;;  %s1374_s27 = smov 112  }
  0x65   : > { %401 = vrot.lane.b32.xlu0 %v1057_v4, %s1357_s18  ;;  %s1369_s18 = smov 120  }
  0x66   : > { %407 = vrot.lane.b32.xlu1 %v1058_v5, %s1358_s19  ;;  %s1644_s19 = sld [smem:[#allocation10 + $0x82]] }
  0x69   : > { %413 = vrot.lane.b32.xlu0 %v1059_v7, %s1360_s22  ;;  %s1646_s22 = sld [smem:[#allocation10 + $0x2]] }
  0x6a   : > { %363 = vrot.lane.b32.xlu1 %v361_v8, %s1361_s23  ;;  %s1373_s23 = smov 8  }
  0x6d   : > { %369 = vrot.lane.b32.xlu0 %v367_v10, %s1362_s25  ;;  %s321_s25 = sld [smem:[#allocation9]] }
  0x6e   : > { %375 = vrot.lane.b32.xlu1 %v373_v11, %s1363_s17  ;;  %s1041_s17 = sld [smem:[#allocation9 + $0x1]] }
  0x71   : > { %381 = vrot.lane.b32.xlu0 %v379_v12, %s1364_s26  ;;  %s1042_s26 = sld [smem:[#allocation9 + $0x2]] }
  0x72   : > { %419 = vrot.lane.b32.xlu1 %v1060_v13, %s1365_s15  ;;  %s324_s15 = sld [smem:[#allocation3]] }
  0x73   : > { %v564_v0 = vstv %s321_s25  ;;  %s1656_s25 = sld [smem:[#allocation4]] }
  0x74   : > { %v568_v1 = vstv %s1041_s17  ;;  %s1661_s17 = sld [smem:[#allocation10 + $0x3]] }
  0x75   : > { %425 = vrot.lane.b32.xlu0 %v1061_v14, %s1366_s20  ;;  %s1376_s20 = smov 3  }
  0x76   : > { %431 = vrot.lane.b32.xlu1 %v1062_v15, %s1367_s21  ;;  %s1861_s21 = smov 1  }
  0x77   : > { %v574_v2 = vstv %s1042_s26  ;;  %s1667_s26 = sld [smem:[#allocation10 + $0x4]] }
  0x78   : > { %v566_v4 = vstv %s324_s15  ;;  %s1669_s15 = sld [smem:[#allocation10 + $0x1]] }
  0x79   : > { %437 = vrot.lane.b32.xlu0 %v1063_v16, %s1368_s24  ;;  %v599_v16 = vlaneseq  ;;  %s1378_s24 = smov 2  }
  0x7a   : > { %387 = vrot.lane.b32.xlu1 %v385_v17, %s1369_s18  ;;  %s1379_s18 = smov 4  }
  0x7d   : > { %443 = vrot.lane.b32.xlu0 %v1064_v18, %s1373_s23  ;;  %v1617_v18 = vand.u32 127, %v599_v16  ;;  %s1648_s23 = sld [smem:[#allocation10]] }
  0x7e   : > { %456 = vperm.xlu1 %1200, %v453_v20  }
  0x7f   : > { %v623_v20 = vadd.s32 1, %v1617_v18  ;;  %v634_v21 = vadd.s32 2, %v1617_v18 }
  0x81   : > { %vm625_vm9 = vcmp.lt.s32.totalorder %v623_v20, 16  ;;  %vm636_vm10 = vcmp.lt.s32.totalorder %v634_v21, 16 }
  0x82   : > { %1202 = vset.pattern.permute.xlu1 %v1375_v58 }
  0xcf   : > { %v346_v22 = vpop.permute.xlu0 %345 }
  0xd0   : > { %v358_v23 = vpop.permute.xlu1 %357  ;;  %348 = vst.msk [vmem:[#allocation2 + $0x4] sm:$0xf] %vm341_vm0, %v346_v22 }
  0xd1   : > { %360 = vst.msk [vmem:[#allocation2 + $0xc] sm:$0xf] %vm341_vm0, %v358_v23  ;;  %v612_v23 = vadd.s32 4294967295, %v1617_v18 }
  0xd3   : > { %v352_v24 = vpop.permute.xlu0 %351  ;;  %vm613_vm11 = vcmp.ge.s32.totalorder %v612_v23, 0  ;;  %vm614_vm12 = vcmp.lt.s32.totalorder %v612_v23, 16 }
  0xd4   : > { %v395_v25 = vpop.permute.xlu1 %394  ;;  %354 = vst.msk [vmem:[#allocation2 + $0x8] sm:$0xf] %vm341_vm0, %v352_v24  ;;  %v1070_v24 = vsel %vm625_vm9, 1.0, %v1371_v19  ;;  %vm615_vm13 = vmand %vm613_vm11, %vm614_vm12 }
  0xd5   : > { %398 = vst.msk [vmem:[#allocation2] sm:$0xf] %vm397_vm2, %v395_v25  ;;  %v1071_v25 = vsel %vm636_vm10, 1.0, %v1371_v19 }
  0xd7   : > { %v402_v26 = vpop.permute.xlu0 %401 }
  0xd8   : > { %v408_v27 = vpop.permute.xlu1 %407  ;;  %404 = vst.msk [vmem:[#allocation2 + $0x4] sm:$0xf] %vm397_vm2, %v402_v26  ;;  %v1069_v26 = vsel %vm615_vm13, 1.0, %v1371_v19 }
  0xd9   : > { %410 = vst.msk [vmem:[#allocation2 + $0x8] sm:$0xf] %vm397_vm2, %v408_v27 }
  0xdb   : > { %v414_v28 = vpop.permute.xlu0 %413 }
  0xdc   : > { %v364_v29 = vpop.permute.xlu1 %363  ;;  %416 = vst.msk [vmem:[#allocation2 + $0xc] sm:$0xf] %vm397_vm2, %v414_v28 }
  0xdd   : > { %366 = vst.msk [vmem:[#allocation2 + $0x10] sm:$0xf] %vm341_vm0, %v364_v29 }
  0xdf   : > { %v370_v30 = vpop.permute.xlu0 %369  ;;  %v448_v33 = vld [vmem:[#allocation2] sm:$0xff] }
  0xe0   : > { %v376_v31 = vpop.permute.xlu1 %375  ;;  %372 = vst.msk [vmem:[#allocation2 + $0x14] sm:$0xf] %vm341_vm0, %v370_v30 }
  0xe1   : > { %378 = vst.msk [vmem:[#allocation2 + $0x18] sm:$0xf] %vm341_vm0, %v376_v31 }
  0xe3   : > { %v382_v32 = vpop.permute.xlu0 %381  ;;  %v449_v34 = vld [vmem:[#allocation2 + $0x8] sm:$0xff] }
  0xe4   : > { %v420_v35 = vpop.permute.xlu1 %419  ;;  %384 = vst.msk [vmem:[#allocation2 + $0x1c] sm:$0xf] %vm341_vm0, %v382_v32  ;;  %v1098_v36 = vpack.c.bf16 %v449_v34, %v448_v33 }
  0xe5   : > { %422 = vst.msk [vmem:[#allocation2 + $0x10] sm:$0xf] %vm397_vm2, %v420_v35 }
  0xe6   : > { %1099 = vmatpush3.bf16.msra.mxu0 %v1098_v36 }
  0xe7   : > { %v426_v37 = vpop.permute.xlu0 %425  ;;  %1100 = vmatprep.subr.bf16.mxu0 %v1359_v9 }
  0xe8   : > { %v432_v38 = vpop.permute.xlu1 %431  ;;  %428 = vst.msk [vmem:[#allocation2 + $0x14] sm:$0xf] %vm397_vm2, %v426_v37 }
  0xe9   : > { %434 = vst.msk [vmem:[#allocation2 + $0x18] sm:$0xf] %vm397_vm2, %v432_v38 }
  0xeb   : > { %v438_v39 = vpop.permute.xlu0 %437 }
  0xec   : > { %v388_v40 = vpop.permute.xlu1 %387  ;;  %440 = vst.msk [vmem:[#allocation2 + $0x1c] sm:$0xf] %vm397_vm2, %v438_v39 }
  0xed   : > { %390 = vst.msk [vmem:[#allocation2 + $0x20] sm:$0xf] %vm341_vm0, %v388_v40 }
  0xef   : > { %v444_v41 = vpop.permute.xlu0 %443  ;;  %v450_v42 = vld [vmem:[#allocation2 + $0x10] sm:$0xff] }
  0xf0   : > { %446 = vst.msk [vmem:[#allocation2 + $0x20] sm:$0xf] %vm397_vm2, %v444_v41 }
  0xf3   : > { %v451_v43 = vld [vmem:[#allocation2 + $0x18] sm:$0xff] }
  0xf4   : > { %v1101_v44 = vpack.c.bf16 %v451_v43, %v450_v42 }
  0xf6   : > { %1102 = vmatpush3.bf16.msra.mxu0 %v1101_v44 }
  0xf7   : > { %1092 = vmatprep.subr.mxu0 %v1371_v19  ;;  %v452_v45 = vld [vmem:[#allocation2 + $0x20] sm:$0xf] }
  0xfa   : > { %1093 = vmatpush3.msk.msra.mxu0 %vm463_vm3, %v452_v45 }
  0xfb   : > { %1095 = vmatmul.mubr.msk.f32.vlgmr.msra.gmra.mrb[0].mxu0 %vm459_vm4, %v447_v46 }
  0xfd   : > { %v457_v47 = vpop.permute.xlu1 %456 }
 0x1ce   : > { %v533_v48 = vpop.f32.mrb[0].mxu0 }
 0x1cf   : > { %v534_v49 = vadd.f32 %v533_v48, %v457_v47  ;;  %v1096_v50 = vpop.f32.mrb[1].mxu0 }
 0x1d1   : > { %vm537_vm5 = vcmp.ge.f32.partialorder %v534_v49, 0.0  ;;  %v538_v51 = vmul.f32 0.01, %v534_v49 }
 0x1d3   : > { %v1608_v52 = vsel %vm537_vm5, %v534_v49, %v538_v51 }
 0x1d4   : > { %v541_v53 = vrot.slane %v1608_v52, 4 }
 0x1d6   : > { %v543_v54 = vadd.f32 %v541_v53, %v1608_v52 }
 0x1d8   : > { %548 = vrot.lane.b32.xlu0 %v543_v54, %s1374_s27  ;;  %v544_v55 = vsel %vm341_vm0, %v543_v54, 0.0  ;;  %s1654_s27 = sld [smem:[#allocation10 + $0x80]] }
 0x1d9   : > { %545 = vadd.xlane.f32.xlu1 %v544_v55 }
 0x1de   : > { %v710_v23 = vstv %s1654_s27 }
 0x24a   : > { %v549_v56 = vpop.permute.xlu0 %548 }
 0x24b   : > { %v551_v57 = vsel %vm341_vm0, %v549_v56, 0.0  ;;  %vm659_vm0 = vcmask 15360  }
 0x24c   : > { %552 = vadd.xlane.f32.xlu0 %v551_v57 }
 0x266   : > { %v546_v59 = vpop.xlane.xlu1 %545 }
 0x2d9   : > { %v553_v60 = vpop.xlane.xlu0 %552 }
 0x2da   : > { %v555_v61 = vsel %vm554_vm6, %v546_v59, %v553_v60  ;;  %vm919_vm6 = vcmask 261120  }
 0x2db   : > { %v556_v62 = vmul.f32 0.03125, %v555_v61 }
 0x2dd   : > { %v558_v63 = vrot.slane %v556_v62, 7 }
 0x2df   : > { %v561_v3 = vsel %vm560_vm7, 0.0, %v558_v63 }
 0x2e0   : > { %v563_v5 = vsel %vm562_vm8, %v561_v3, 0.0 }
 0x2e1   : > { %v565_v6 = vmul.f32 %v564_v0, %v563_v5  ;;  %v569_v7 = vmul.f32 %v568_v1, %v563_v5  ;;  %v575_v8 = vmul.f32 %v574_v2, %v563_v5 }
 0x2e3   : > { %v567_v9 = vadd.f32 %v566_v4, %v565_v6  ;;  %v571_v10 = vrot.slane %v569_v7, 1  ;;  %v577_v12 = vrot.slane %v575_v8, 2  ;;  %v742_v6 = vstv %s1644_s19 }
 0x2e5   : > { %v573_v11 = vadd.f32 %v571_v10, %v567_v9 }
 0x2e7   : > { %v579_v13 = vadd.f32 %v577_v12, %v573_v11  ;;  %v734_v11 = vstv %s1646_s22 }
 0x2e9   : > { %v1067_v14 = vmul.f32 -1.442695, %v579_v13 }
 0x2eb   : > { %1204 = vpow2.f32 %v1067_v14 }
 0x2f5   : > { %v1205_v15 = vpop.eup %1204 }
 0x2f6   : > { %v583_v17 = vadd.f32 1.0, %v1205_v15  ;;  %v706_v15 = vstv %s1648_s23 }
 0x2f8   : > { %1206 = vrcp.f32 %v583_v17 }
 0x302   : > { %v1207_v22 = vpop.eup %1206 }
 0x303   : > { %592 = vperm.xlu1 %1202, %v1207_v22   ;;  %588 = vperm.xlu0 %1201, %v1207_v22  }
 0x307   : > { %630 = vrot.lane.b32.xlu1 %v1070_v24, %s1862_s16  ;;  %1203 = vset.pattern.permute.xlu0 %v1375_v58 }
 0x30b   : > { %641 = vrot.lane.b32.xlu1 %v1071_v25, %s1862_s16 }
 0x30f   : > { %619 = vrot.lane.b32.xlu1 %v1069_v26, %s1862_s16  ;;  %s1725_s16 = sld [smem:[#allocation10 + $0x6]] }
 0x382   : > { %v593_v27 = vpop.permute.xlu1 %592  ;;  %v589_v28 = vpop.permute.xlu0 %588 }
 0x383   : > { %v596_v29 = vsel %vm595_vm14, %v589_v28, %v593_v27  ;;  %v749_v28 = vstv %s1661_s17 }
 0x384   : > { %v1630_v30 = vmul.f32 %v596_v29, %v1608_v52  ;;  %v1634_v31 = vmul.f32 %v596_v29, %v541_v53 }
 0x386   : > { %v646_v32 = vsel %vm645_vm15, %v1630_v30, 0.0  ;;  %v663_v33 = vsel %vm645_vm15, %v1634_v31, 0.0  ;;  %v677_v34 = vsel %vm645_vm15, %v1630_v30, -inf  ;;  %v690_v35 = vsel %vm645_vm15, %v1634_v31, -inf  ;;  %v631_v36 = vpop.permute.xlu1 %630 }
 0x387   : > { %v647_v37 = vrot.slane %v646_v32, 4  ;;  %v664_v38 = vrot.slane %v663_v33, 4  ;;  %v678_v39 = vrot.slane %v677_v34, 4  ;;  %v633_v40 = vsel %vm595_vm14, %v1070_v24, %v631_v36 }
 0x388   : > { %v691_v43 = vrot.slane %v690_v35, 4  ;;  %778 = vrot.lane.b32.xlu0 %v633_v40, %s1376_s20  ;;  %s1676_s20 = sld [smem:[#allocation10 + $0x83]]  ;;  %v763_v36 = vstv %s1667_s26  ;;  %s1730_s26 = sld [smem:[#allocation10 + $0x85]] }
 0x389   : > { %v648_v41 = vadd.f32 %v647_v37, %v646_v32  ;;  %v665_v42 = vadd.f32 %v664_v38, %v663_v33  ;;  %v679_v44 = vmax.f32 %v677_v34, %v678_v39  ;;  %v718_v37 = vstv %s1669_s15  ;;  %s1742_s15 = sld [smem:[#allocation10 + $0x86]] }
 0x38a   : > { %v642_v45 = vpop.permute.xlu1 %641  ;;  %v692_v52 = vmax.f32 %v690_v35, %v691_v43 }
 0x38b   : > { %v680_v46 = vrot.slane %v679_v44, 2  ;;  %v649_v47 = vrot.slane %v648_v41, 2  ;;  %v666_v48 = vrot.slane %v665_v42, 2  ;;  %v644_v3 = vsel %vm595_vm14, %v1071_v25, %v642_v45 }
 0x38c   : > { %v693_v60 = vrot.slane %v692_v52, 2 }
 0x38d   : > { %v681_v49 = vmax.f32 %v679_v44, %v680_v46  ;;  %v650_v50 = vadd.f32 %v649_v47, %v648_v41  ;;  %v667_v51 = vadd.f32 %v666_v48, %v665_v42 }
 0x38e   : > { %v620_v53 = vpop.permute.xlu1 %619  ;;  %v694_v63 = vmax.f32 %v692_v52, %v693_v60  ;;  %v756_v42 = vstv %s1676_s20  ;;  %v798_v60 = vstv %s1725_s16  ;;  %s1874_s16 = smov 16   ;;  %s1380_s20 = smov [#allocation12]  }
 0x38f   : > { %v682_v54 = vrot.slane %v681_v49, 1  ;;  %v622_v55 = vsel %vm595_vm14, %v1069_v26, %v620_v53  ;;  %v651_v56 = vrot.slane %v650_v50, 1  ;;  %v668_v59 = vrot.slane %v667_v51, 1 }
 0x390   : > { %714 = vrot.lane.b32.xlu0 %v622_v55, %s1861_s21  ;;  %v695_v1 = vrot.slane %v694_v63, 1  ;;  %v703_v26 = vstv %s1656_s25  ;;  %s1703_s21 = sld [smem:[#allocation10 + $0x5]] }
 0x391   : > { %v683_v57 = vmax.f32 %v681_v49, %v682_v54  ;;  %v652_v58 = vadd.f32 %v651_v56, %v650_v50  ;;  %v669_v62 = vadd.f32 %v668_v59, %v667_v51  ;;  %v601_v51 = vadd.s32 4294967294, %v1617_v18 }
 0x392   : > { %v696_v2 = vmax.f32 %v694_v63, %v695_v1  ;;  %v806_v1 = vstv %s1742_s15 }
 0x393   : > { %685 = vrot.lane.b32.xlu1 %v683_v57, %s1378_s24  ;;  %v654_v61 = vmul.f32 0.25, %v652_v58  ;;  %v670_v0 = vmul.f32 0.25, %v669_v62  ;;  %vm602_vm2 = vcmp.ge.s32.totalorder %v601_v51, 0  ;;  %vm603_vm4 = vcmp.lt.s32.totalorder %v601_v51, 16 }
 0x394   : > { %vm604_vm5 = vmand %vm602_vm2, %vm603_vm4 }
 0x396   : > { %v782_v54 = vstv %s1703_s21  ;;  %s1875_s21 = smov 1  }
 0x397   : > { %656 = vrot.lane.b32.xlu1 %v654_v61, %s1378_s24  ;;  %v790_v61 = vstv %s1730_s26 }
 0x39b   : > { %672 = vrot.lane.b32.xlu1 %v670_v0, %s1378_s24 }
 0x39f   : > { %698 = vrot.lane.b32.xlu1 %v696_v2, %s1378_s24  ;;  %s1688_s24 = sld [smem:[#allocation10 + $0x84]]  ;;  %v1757_v2 = vsel %vm604_vm5, 1.0, %v1371_v19 }
 0x3a3   : > { %870 = vrot.lane.b32.xlu1 %v644_v3, %s1379_s18  ;;  %s1696_s18 = sld [smem:[#allocation10 + $0x81]] }
 0x3a5   : > { %v770_v50 = vstv %s1688_s24  ;;  %s1278_s24 = sshll.u32 %s1380_s20, 4  ;;  %s1279_s24 = int_to_ptr.vmem [resolvable:$false] %s1278_s24 }
 0x3a9   : > { %v726_v53 = vstv %s1696_s18  ;;  %s1280_s18 = scalar_lea.vmem %s1279_s24, 256 }
 0x3fa   : > { %v1650_v4 = vpop.permute.xlu0 %778 }
 0x402   : > { %v715_v12 = vpop.permute.xlu0 %714 }
 0x405   : > { %v686_v5 = vpop.permute.xlu1 %685 }
 0x406   : > { %v688_v7 = vsel %vm659_vm0, 0.0, %v686_v5 }
 0x407   : > { %v1659_v8 = vsel %vm661_vm1, %v688_v7, 0.0 }
 0x408   : > { %v827_v9 = vmul.f32 %v742_v6, %v1659_v8  ;;  %v1686_v21 = vmul.f32 %v715_v12, %v1659_v8  ;;  %v789_v43 = vmul.f32 %v1650_v4, %v1659_v8 }
 0x409   : > { %v657_v10 = vpop.permute.xlu1 %656 }
 0x40a   : > { %v660_v13 = vsel %vm659_vm0, 0.0, %v657_v10  ;;  %829 = vrot.lane.b32.xlu0 %v827_v9, %s1353_s6  ;;  %v815_v34 = vmul.f32 %v1686_v21, %v710_v23  ;;  %v851_v57 = vmul.f32 %v789_v43, %v770_v50  ;;  %v727_v5 = vmul.f32 %v726_v53, %v1686_v21 }
 0x40b   : > { %v1674_v14 = vsel %vm661_vm1, %v660_v13, 0.0 }
 0x40c   : > { %v821_v17 = vmul.f32 %v734_v11, %v1674_v14  ;;  %v1683_v20 = vmul.f32 %v715_v12, %v1674_v14  ;;  %v1711_v33 = vmul.f32 %v1650_v4, %v1674_v14  ;;  %v750_v9 = vmul.f32 %v749_v28, %v1674_v14 }
 0x40d   : > { %v673_v22 = vpop.permute.xlu1 %672 }
 0x40e   : > { %v675_v24 = vsel %vm659_vm0, 0.0, %v673_v22  ;;  %823 = vrot.lane.b32.xlu1 %v821_v17, %s1353_s6  ;;  %v813_v25 = vmul.f32 %v1683_v20, %v706_v15  ;;  %v845_v46 = vmul.f32 %v1711_v33, %v763_v36 }
 0x40f   : > { %v1700_v27 = vsel %vm661_vm1, %v675_v24, 0.0 }
 0x410   : > { %v733_v29 = vmul.f32 %v715_v12, %v1700_v27  ;;  %v833_v32 = vmul.f32 %v749_v28, %v1700_v27  ;;  %v814_v38 = vadd.f32 %v813_v25, %v703_v26  ;;  %v797_v47 = vmul.f32 %v1650_v4, %v1700_v27 }
 0x411   : > { %v699_v35 = vpop.permute.xlu1 %698  ;;  %v764_v10 = vmul.f32 %v763_v36, %v1700_v27 }
 0x412   : > { %v701_v39 = vsel %vm659_vm0, 0.0, %v699_v35  ;;  %835 = vrot.lane.b32.xlu1 %v833_v32, %s1353_s6  ;;  %v817_v40 = vmul.f32 %v733_v29, %v718_v37  ;;  %v816_v44 = vadd.f32 %v815_v34, %v814_v38  ;;  %v857_v58 = vmul.f32 %v797_v47, %v782_v54 }
 0x413   : > { %v1723_v41 = vsel %vm661_vm1, %v701_v39, 0.0  ;;  %v735_v7 = vmul.f32 %v734_v11, %v733_v29  ;;  %v799_v13 = vmul.f32 %v798_v60, %v797_v47  ;;  %v900_v47 = vshrl.u32 %v599_v16, 7 }
 0x414   : > { %v839_v45 = vmul.f32 %v756_v42, %v1723_v41  ;;  %v741_v48 = vmul.f32 %v715_v12, %v1723_v41  ;;  %v818_v52 = vadd.f32 %v817_v40, %v816_v44  ;;  %v805_v18 = vmul.f32 %v1650_v4, %v1723_v41 }
 0x415   : > { %v871_v49 = vpop.permute.xlu1 %870  ;;  %v719_v4 = vmul.f32 %v718_v37, %v1683_v20  ;;  %v771_v11 = vmul.f32 %v770_v50, %v1723_v41  ;;  %v783_v12 = vmul.f32 %v782_v54, %v1711_v33 }
 0x416   : > { %841 = vrot.lane.b32.xlu0 %v839_v45, %s1353_s6  ;;  %847 = vrot.lane.b32.xlu1 %v845_v46, %s1355_s11  ;;  %v819_v55 = vmul.f32 %v741_v48, %v726_v53  ;;  %v873_v56 = vmul.f32 %v871_v49, %v1674_v14  ;;  %v880_v63 = vmul.f32 %v871_v49, %v1659_v8 }
 0x417   : > { %v863_v0 = vmul.f32 %v805_v18, %v790_v61  ;;  %v743_v19 = vmul.f32 %v742_v6, %v741_v48  ;;  %v791_v6 = vmul.f32 %v790_v61, %v789_v43  ;;  %v901_v48 = vsub.s32 0, %v900_v47 }
 0x418   : > { %v820_v59 = vadd.f32 %v819_v55, %v818_v52  ;;  %v874_v62 = vmul.f32 %v873_v56, %v798_v60  ;;  %v881_v3 = vmul.f32 %v880_v63, %v806_v1 }
 0x41a   : > { %853 = vrot.lane.b32.xlu0 %v851_v57, %s1355_s11  ;;  %859 = vrot.lane.b32.xlu1 %v857_v58, %s1355_s11 }
 0x41e   : > { %865 = vrot.lane.b32.xlu0 %v863_v0, %s1355_s11  ;;  %876 = vrot.lane.b32.xlu1 %v874_v62, %s1354_s10 }
 0x422   : > { %883 = vrot.lane.b32.xlu0 %v881_v3, %s1354_s10  ;;  %608 = vrot.lane.b32.xlu1 %v1757_v2, %s1874_s16 }
 0x426   : > { %909 = vrot.lane.b32.xlu0 %v1634_v31, %s1875_s21  ;;  %721 = vrot.lane.b32.xlu1 %v719_v4, %s1353_s6  ;;  %v757_v31 = vmul.f32 %v756_v42, %v1659_v8  ;;  %v807_v8 = vmul.f32 %v806_v1, %v805_v18 }
 0x42a   : > { %729 = vrot.lane.b32.xlu0 %v727_v5, %s1353_s6  ;;  %737 = vrot.lane.b32.xlu1 %v735_v7, %s1353_s6 }
 0x42e   : > { %745 = vrot.lane.b32.xlu0 %v743_v19, %s1353_s6  ;;  %752 = vrot.lane.b32.xlu1 %v750_v9, %s1355_s11 }
 0x432   : > { %759 = vrot.lane.b32.xlu0 %v757_v31, %s1355_s11  ;;  %766 = vrot.lane.b32.xlu1 %v764_v10, %s1355_s11 }
 0x436   : > { %773 = vrot.lane.b32.xlu0 %v771_v11, %s1355_s11  ;;  %785 = vrot.lane.b32.xlu1 %v783_v12, %s1354_s10  ;;  %s1075_s11 = sshll.u32 %s1448_s4, 7 }
 0x437   : > { %s1807_s25 = scalar_lea.hbm %s1857_s7, %s1075_s11 }
 0x43a   : > { %793 = vrot.lane.b32.xlu0 %v791_v6, %s1354_s10  ;;  %801 = vrot.lane.b32.xlu1 %v799_v13, %s1354_s10 }
 0x43e   : > { %809 = vrot.lane.b32.xlu0 %v807_v8, %s1354_s10 }
 0x47c   : > { %v830_v20 = vpop.permute.xlu0 %829 }
 0x480   : > { %v824_v14 = vpop.permute.xlu1 %823 }
 0x481   : > { %v826_v17 = vadd.f32 %v824_v14, %v820_v59 }
 0x483   : > { %v832_v21 = vadd.f32 %v830_v20, %v826_v17 }
 0x484   : > { %v836_v22 = vpop.permute.xlu1 %835 }
 0x485   : > { %v838_v24 = vadd.f32 %v836_v22, %v832_v21 }
 0x488   : > { %v848_v25 = vpop.permute.xlu1 %847  ;;  %v842_v28 = vpop.permute.xlu0 %841 }
 0x489   : > { %v844_v29 = vadd.f32 %v842_v28, %v838_v24 }
 0x48b   : > { %v850_v32 = vadd.f32 %v848_v25, %v844_v29 }
 0x48c   : > { %v860_v33 = vpop.permute.xlu1 %859  ;;  %v854_v34 = vpop.permute.xlu0 %853 }
 0x48d   : > { %v856_v35 = vadd.f32 %v854_v34, %v850_v32 }
 0x48f   : > { %v862_v36 = vadd.f32 %v860_v33, %v856_v35 }
 0x490   : > { %v866_v37 = vpop.permute.xlu0 %865  ;;  %v877_v39 = vpop.permute.xlu1 %876 }
 0x491   : > { %v868_v38 = vadd.f32 %v866_v37, %v862_v36 }
 0x493   : > { %v879_v40 = vadd.f32 %v877_v39, %v868_v38 }
 0x494   : > { %v884_v42 = vpop.permute.xlu0 %883  ;;  %v609_v54 = vpop.permute.xlu1 %608 }
 0x495   : > { %v886_v43 = vadd.f32 %v884_v42, %v879_v40  ;;  %v611_v55 = vsel %vm595_vm14, %v1757_v2, %v609_v54 }
 0x496   : > { %v705_v56 = vmul.f32 %v1700_v27, %v611_v55  ;;  %v709_v58 = vmul.f32 %v1723_v41, %v611_v55 }
 0x497   : > { %v1073_v44 = vmul.f32 -1.442695, %v886_v43 }
 0x498   : > { %v910_v51 = vpop.permute.xlu0 %909  ;;  %v707_v57 = vmul.f32 %v706_v15, %v705_v56  ;;  %v711_v18 = vmul.f32 %v710_v23, %v709_v58  ;;  %v722_v60 = vpop.permute.xlu1 %721 }
 0x499   : > { %1208 = vpow2.f32 %v1073_v44 }
 0x49a   : > { %v708_v16 = vadd.f32 %v707_v57, %v703_v26 }
 0x49c   : > { %v712_v59 = vadd.f32 %v711_v18, %v708_v16  ;;  %v730_v62 = vpop.permute.xlu0 %729  ;;  %v738_v0 = vpop.permute.xlu1 %737 }
 0x49e   : > { %v724_v61 = vadd.f32 %v722_v60, %v712_v59 }
 0x4a0   : > { %v732_v63 = vadd.f32 %v730_v62, %v724_v61  ;;  %v746_v3 = vpop.permute.xlu0 %745  ;;  %v753_v2 = vpop.permute.xlu1 %752 }
 0x4a2   : > { %v740_v1 = vadd.f32 %v738_v0, %v732_v63 }
 0x4a3   : > { %v1209_v45 = vpop.eup %1208 }
 0x4a4   : > { %v896_v46 = vadd.f32 1.0, %v1209_v45  ;;  %v748_v4 = vadd.f32 %v746_v3, %v740_v1  ;;  %v760_v27 = vpop.permute.xlu0 %759  ;;  %v767_v15 = vpop.permute.xlu1 %766 }
 0x4a6   : > { %1210 = vrcp.f32 %v896_v46  ;;  %v755_v5 = vadd.f32 %v753_v2, %v748_v4 }
 0x4a8   : > { %v762_v7 = vadd.f32 %v760_v27, %v755_v5  ;;  %v774_v41 = vpop.permute.xlu0 %773  ;;  %v786_v9 = vpop.permute.xlu1 %785 }
 0x4aa   : > { %v769_v19 = vadd.f32 %v767_v15, %v762_v7 }
 0x4ac   : > { %v776_v26 = vadd.f32 %v774_v41, %v769_v19  ;;  %v794_v31 = vpop.permute.xlu0 %793  ;;  %v802_v11 = vpop.permute.xlu1 %801 }
 0x4ae   : > { %v788_v23 = vadd.f32 %v786_v9, %v776_v26 }
 0x4b0   : > { %v1211_v49 = vpop.eup %1210  ;;  %v796_v10 = vadd.f32 %v794_v31, %v788_v23  ;;  %v810_v6 = vpop.permute.xlu0 %809 }
 0x4b1   : > { %v907_v50 = vrot.slane %v1211_v49, %v901_v48 }
 0x4b2   : > { %v804_v12 = vadd.f32 %v802_v11, %v796_v10 }
 0x4b3   : > { %v912_v52 = vmul.f32 %v910_v51, %v907_v50 }
 0x4b4   : > { %v812_v13 = vadd.f32 %v810_v6, %v804_v12 }
 0x4b5   : > { %v914_v53 = vrot.slane %v912_v52, 4 }
 0x4b6   : > { %v1072_v8 = vmul.f32 -1.442695, %v812_v13 }
 0x4b7   : > { %915 = vrot.lane.b32.xlu1 %v914_v53, %s1353_s6  ;;  %s312_s6 = sand.u32 1, %s1340_s29  }
 0x4b8   : > { %1212 = vpow2.f32 %v1072_v8  ;;  %s1038_s10 = sshll.u32 %s312_s6, 3  ;;  %s922_s4 = scalar_lea.sflag [#allocation7], %s312_s6 }
 0x4b9   : > { %s314_s19 = scalar_lea.vmem [#allocation12], %s1038_s10 }
 0x4ba   : > { %s935_s22 = sshll.u32 %s314_s19, 4  ;;  %s1809_s22 = int_to_ptr.vmem [resolvable:$true] %s935_s22 }
 0x4bb   : > { %s1274_s17 = scalar_lea.vmem %s1809_s22, 128  ;;  %p1281_p13 = scmp.lt.s32.totalorder %s1809_s22, %s1279_s24 }
 0x4bc   : > { %p1275_p4 = scmp.ne.s32.totalorder %s1809_s22, %s1274_s17  ;;  %p1282_p1 = scmp.lt.s32.totalorder %s1280_s18, %s1274_s17 }
 0x4be   : > { %p1276_p8 = pnand %p1275_p4, %p1876_p7  ;;  %p1283_p2 = por %p1282_p1, %p1281_p13 }
 0x4c0   : > { %p1277_p11 = pneg %p1276_p8 }
 0x4c2   : > { %v1213_v14 = vpop.eup %1212  ;;  %p1284_p6 = pnand %p1283_p2, %p1277_p11 }
 0x4c3   : > { %v890_v17 = vadd.f32 1.0, %v1213_v14 }
 0x4c5   : > { %1214 = vrcp.f32 %v890_v17 }
 0x4cf   : > { %v1215_v20 = vpop.eup %1214 }
 0x4d0   : > { %v902_v21 = vrot.slane %v1215_v20, %v901_v48 }
 0x4d2   : > { %v903_v22 = vmul.f32 %v902_v21, %v1630_v30 }
 0x529   : > { %v916_v24 = vpop.permute.xlu1 %915 }
 0x52a   : > { %v918_v25 = vsel %vm463_vm3, %v903_v22, %v916_v24 }
 0x52b   : > { %920 = vst.msk [vmem:[%s314_s19] sm:$0xff] %vm919_vm6, %v918_v25 }
 0x52c   : > { %1287 = shalt.err (!%p1284_p6)
}
 0x52d   : > { %s1288_s26 = scalar_lea.hbm %s1807_s25, 128  ;;  %s1292_s21 = scalar_lea.hbm %s1857_s7, 256 }
 0x52e   : > { %p1289_p0 = scmp.ne.s32.totalorder %s1807_s25, %s1288_s26  ;;  %p1293_p10 = scmp.lt.u32.totalorder %s1807_s25, %s1857_s7 }
 0x52f   : > { %p1294_p12 = scmp.lt.u32.totalorder %s1292_s21, %s1288_s26  ;;  %p1296_p4 = scmp.lt.u32.totalorder %s1288_s26, %s1807_s25 }
 0x530   : > { %p1290_p5 = pnand %p1289_p0, %p1876_p7 }
 0x531   : > { %p1295_p3 = por %p1294_p12, %p1293_p10 }
 0x532   : > { %p1291_p9 = pneg %p1290_p5 }
 0x533   : > { %p1297_p8 = por %p1296_p4, %p1295_p3 }
 0x535   : > { %p1298_p11 = pnand %p1297_p8, %p1291_p9 }
 0x537   : > { %1301 = shalt.err (!%p1298_p11)
}
 0x538   : > { %1115 = dma.vmem_to_hbm [thread:$0]  (%p1876_p7), %s1809_s22, 128, %s1807_s25, %s922_s4  }
 0x539 PF: > { %p1137_p13 = scmp.ge.s32.totalorder %s1348_s8, 2  ;;  %s947_s11 = sand.u32 1, %s1336_s28  }
 0x53a   : > { %p1877_p1 = scmp.ne.s32.totalorder %s1864_s14, 0  ;;  %s948_s19 = scalar_lea.sflag [#allocation7], %s947_s11 }
 0x53c   : > { %p1128_p2 = pnand %p1137_p13, %p1877_p1 }
 0x53e   : > { %1331 = dma.done.wait (!%p1128_p2), %s948_s19, 128  }
 0x53f   : > { %1333 = vsyncadd (!%p1128_p2), %s948_s19, 4294967168  ;;  %p22_p6 = scmp.ge.s32.totalorder %s1452_s9, 4   ;;  %s1878_s28 = smov %s1340_s29 }
 0x540   : > { %s1879_s29 = smov %s1344_s30  ;;  %s1880_s30 = smov %s1463_s12 }
 0x541   : > { %s1881_s8 = smov %s1452_s9  ;;  %24 = sbr.rel (!%p22_p6) target bundleno = 9 (0x9), region = 98 }
 0x548   :  { %953 = vsyncpa [#allocation6], 1 }
 0x549   :  { %955 = vsyncpa [#allocation6 + $0x1], 1 }
 0x54a   :  { %956 = vsyncpa [#allocation7], 1 }
 0x54b   :  { %958 = vsyncpa [#allocation7 + $0x1], 1 }
 0x54c   :  { %959 = vsyncpa [#allocation8], 1 }
 0x54d   :  { %961 = vsyncpa [#allocation8 + $0x1], 1 }
 0x54e   :  { %962 = vsyncpa [#allocation11], 1 }

</bundles_post_ra>
